<compile_context>
chip_gen: v7x
topology: tpu7x:2x2x1
jax: 0.10.0
libtpu: 0.0.40
codegen_flags: <defaults>
</compile_context>

<pallas_src>
import math

import jax
import jax.numpy as jnp
from jax import lax
from jax.experimental import pallas as pl
from jax.experimental.pallas import tpu as pltpu

# ---- scaled-down ViT-B/16 CLIP visual-head dims ----
B = 2          # batch
S = 8          # sequence length (CLS + patch tokens); 197 in real ViT-B/16
D = 64         # transformer width (768 real)
H = 4          # attention heads (12 real)
HD = D // H    # head dim
MLP = 4 * D    # MLP hidden (3072 real)
E = 32         # projection / feature dim (512 real)
C = 10         # num_classes (100 real)
WE_H = 16      # weight_energy hidden (32 real)
EPS = 1e-5

COMPUTE_DTYPE = jnp.bfloat16   # MXU input dtype (f32 accumulation everywhere)
BATCH_TILE = B                 # batch rows per grid step; set B // 2 on v7x (2 TCs)


# ----------------------------- shared math helpers -----------------------------
def _ln(x, g, b):
    mu = jnp.mean(x, axis=-1, keepdims=True)
    xc = x - mu
    var = jnp.mean(xc * xc, axis=-1, keepdims=True)
    return xc * lax.rsqrt(var + EPS) * g + b


def _quick_gelu(x):
    # CLIP uses QuickGELU: x * sigmoid(1.702 x)
    return x * jax.nn.sigmoid(1.702 * x)


def _softmax(s):
    m = jnp.max(s, axis=-1, keepdims=True)
    e = jnp.exp(s - m)
    return e / jnp.sum(e, axis=-1, keepdims=True)


def _resblock(x, bb,
              ln1g, ln1b, wqkv, bqkv, wout, bout,
              ln2g, ln2b, wfc1, bfc1, wfc2, bfc2):
    """One CLIP ResidualAttentionBlock over x: [bb*S, D] f32 residual stream.

    Matmul weights are COMPUTE_DTYPE (bf16); LN / softmax / QuickGELU stay f32;
    accumulation is f32 via preferred_element_type.  The 1/sqrt(HD) attention
    scale is pre-folded into the Q columns of wqkv/bqkv by prepare_params().
    Pure jnp — usable both inside the Pallas kernel and as the XLA reference.
    """
    cdt = wqkv.dtype

    # --- multi-head self-attention branch ---
    h = _ln(x, ln1g, ln1b).astype(cdt)
    qkv = jnp.dot(h, wqkv, preferred_element_type=jnp.float32) + bqkv   # [N, 3D] f32
    q = qkv[:, 0 * D:1 * D].reshape(bb, S, D).astype(cdt)
    k = qkv[:, 1 * D:2 * D].reshape(bb, S, D).astype(cdt)
    v = qkv[:, 2 * D:3 * D].reshape(bb, S, D).astype(cdt)
    heads = []
    for hh in range(H):                      # tiny static loop; lane-slices per head
        sl = slice(hh * HD, (hh + 1) * HD)
        s = jnp.einsum('bqd,bkd->bqk', q[..., sl], k[..., sl],
                       preferred_element_type=jnp.float32)              # [bb, S, S]
        p = _softmax(s).astype(cdt)
        heads.append(jnp.einsum('bqk,bkd->bqd', p, v[..., sl],
                                preferred_element_type=jnp.float32))    # [bb, S, HD]
    attn = jnp.concatenate(heads, axis=-1).reshape(bb * S, D).astype(cdt)
    x = x + jnp.dot(attn, wout, preferred_element_type=jnp.float32) + bout

    # --- MLP branch (Linear -> QuickGELU -> Linear) ---
    h = _ln(x, ln2g, ln2b).astype(cdt)
    m = _quick_gelu(jnp.dot(h, wfc1, preferred_element_type=jnp.float32) + bfc1)
    x = x + jnp.dot(m.astype(cdt), wfc2, preferred_element_type=jnp.float32) + bfc2
    return x


def _head_tail(cls, tail_params):
    """ln_post(CLS) @ proj, then fc(...) and weight_energy(...).  Runs in XLA."""
    (lnpg, lnpb, proj, fcw, fcb, we1w, we1b, we2w, we2b) = tail_params
    cls = _ln(cls, lnpg, lnpb)                       # [B, D]
    feat = jnp.dot(cls, proj)                        # [B, E]
    out = jnp.dot(feat, fcw) + fcb                   # [B, C]
    score = jnp.dot(jnp.maximum(jnp.dot(feat, we1w) + we1b, 0.0), we2w) + we2b
    return out, feat, score


# --------------------------------- Pallas kernel --------------------------------
def resblocks_kernel(x_ref,
                     ln1g_ref, ln1b_ref, wqkv_ref, bqkv_ref, wout_ref, bout_ref,
                     ln2g_ref, ln2b_ref, wfc1_ref, bfc1_ref, wfc2_ref, bfc2_ref,
                     cls_ref):
    x3 = x_ref[...]                                  # [bb, S, D]
    bb = x3.shape[0]
    x = x3.reshape(bb * S, D)                        # all batch rows in one tile
    for blk in range(2):                             # the two fine-tuned resblocks
        x = _resblock(
            x, bb,
            ln1g_ref[blk], ln1b_ref[blk], wqkv_ref[blk], bqkv_ref[blk],
            wout_ref[blk], bout_ref[blk], ln2g_ref[blk], ln2b_ref[blk],
            wfc1_ref[blk], bfc1_ref[blk], wfc2_ref[blk], bfc2_ref[blk])
    # only the CLS token is consumed downstream (ft_blocks takes x[:, 0, :])
    cls_ref[...] = x.reshape(bb, S, D)[:, 0:1, :]


# ---------------------------------- wrapper -------------------------------------
def clipnet_ft_forward(x, params):
    rb_params, tail_params = params
    batch = x.shape[0]
    bb = min(BATCH_TILE, batch)
    grid = (batch // bb,)

    def const_spec(a):
        nd = a.ndim
        return pl.BlockSpec(a.shape, lambda i, _nd=nd: (0,) * _nd)

    cls = pl.pallas_call(
        resblocks_kernel,
        grid=grid,
        in_specs=[pl.BlockSpec((bb, S, D), lambda i: (i, 0, 0))]
                 + [const_spec(p) for p in rb_params],
        out_specs=pl.BlockSpec((bb, 1, D), lambda i: (i, 0, 0)),
        out_shape=jax.ShapeDtypeStruct((batch, 1, D), jnp.float32),
        compiler_params=pltpu.CompilerParams(
            dimension_semantics=("parallel",)),
    )(x, *rb_params)[:, 0, :]                        # [B, D] pre-ln_post CLS tokens

    # CLS tail (ln_post, proj, fc, weight_energy): 1-row matmuls that underfill
    # the MXU and would force lane-masked stores -> run them in plain XLA.
    return _head_tail(cls, tail_params)


# -------------------------- deterministic parameter init ------------------------
def init_params(key):
    ks = jax.random.split(key, 15)
    n = lambda k, shape, s=0.02: (s * jax.random.normal(k, shape)).astype(jnp.float32)
    ln1g = jnp.ones((2, 1, D), jnp.float32); ln1b = jnp.zeros((2, 1, D), jnp.float32)
    ln2g = jnp.ones((2, 1, D), jnp.float32); ln2b = jnp.zeros((2, 1, D), jnp.float32)
    wqkv = n(ks[0], (2, D, 3 * D)); bqkv = n(ks[1], (2, 1, 3 * D))
    wout = n(ks[2], (2, D, D));     bout = n(ks[3], (2, 1, D))
    wfc1 = n(ks[4], (2, D, MLP));   bfc1 = n(ks[5], (2, 1, MLP))
    wfc2 = n(ks[6], (2, MLP, D));   bfc2 = n(ks[7], (2, 1, D))
    lnpg = jnp.ones((1, D), jnp.float32); lnpb = jnp.zeros((1, D), jnp.float32)
    proj = n(ks[8], (D, E))
    fcw  = n(ks[9], (E, C));        fcb  = n(ks[10], (1, C))
    we1w = n(ks[11], (E, WE_H));    we1b = n(ks[12], (1, WE_H))
    we2w = n(ks[13], (WE_H, 1));    we2b = n(ks[14], (1, 1))
    rb = (ln1g, ln1b, wqkv, bqkv, wout, bout, ln2g, ln2b, wfc1, bfc1, wfc2, bfc2)
    tail = (lnpg, lnpb, proj, fcw, fcb, we1w, we1b, we2w, we2b)
    return rb, tail


def prepare_params(params, compute_dtype=COMPUTE_DTYPE):
    """Fold the attention scale into the Q columns and cast matmul weights to bf16."""
    rb, tail = params
    (ln1g, ln1b, wqkv, bqkv, wout, bout, ln2g, ln2b,
     wfc1, bfc1, wfc2, bfc2) = rb
    scale = 1.0 / math.sqrt(HD)
    wqkv = wqkv.at[:, :, :D].multiply(scale)        # pre-scale Q weight columns
    bqkv = bqkv.at[:, :, :D].multiply(scale)        # and Q bias
    c = lambda w: w.astype(compute_dtype)
    rb = (ln1g, ln1b, c(wqkv), bqkv, c(wout), bout,
          ln2g, ln2b, c(wfc1), bfc1, c(wfc2), bfc2)
    return rb, tail                                  # tail stays f32 (runs in XLA)


# ------------------------------ pure-JAX reference -------------------------------
def _reference_forward(x, params):
    rb_params, tail_params = params
    (ln1g, ln1b, wqkv, bqkv, wout, bout, ln2g, ln2b,
     wfc1, bfc1, wfc2, bfc2) = rb_params
    bb = x.shape[0]
    y = x.reshape(bb * S, D)
    for blk in range(2):
        y = _resblock(y, bb,
                      ln1g[blk], ln1b[blk], wqkv[blk], bqkv[blk],
                      wout[blk], bout[blk], ln2g[blk], ln2b[blk],
                      wfc1[blk], bfc1[blk], wfc2[blk], bfc2[blk])
    cls = y.reshape(bb, S, D)[:, 0, :]
    return _head_tail(cls, tail_params)


# TODO(synk): fc=True branch, compute_sigmoid / uncertainty / log_sum_exp / self.MLP,
# and visual_forward_one/two are not on the default forward path (and/or need the
# full frozen CLIP visual backbone), so they are not implemented here.

if __name__ == "__main__":
    key = jax.random.PRNGKey(0)
    kx, kp = jax.random.split(key)
    x = jax.random.normal(kx, (B, S, D), dtype=jnp.float32)
    params = prepare_params(init_params(kp))

    out, feat, score = jax.jit(clipnet_ft_forward)(x, params)
    jax.block_until_ready((out, feat, score))

    ref_out, ref_feat, ref_score = _reference_forward(x, params)

    assert out.shape == (B, C) and feat.shape == (B, E) and score.shape == (B, 1)
    assert jnp.allclose(out, ref_out, atol=2e-3, rtol=2e-2)
    assert jnp.allclose(feat, ref_feat, atol=2e-3, rtol=2e-2)
    assert jnp.allclose(score, ref_score, atol=2e-3, rtol=2e-2)

    print("KERNEL_OK")
</pallas_src>

<mosaic_0001>
module attributes {stable_mosaic.version = 11 : i64} {
  func.func @resblocks_kernel(%arg0: i32, %arg1: memref<2x8x64xf32, #tpu.memory_space<vmem>>, %arg2: memref<2x1x64xf32, #tpu.memory_space<vmem>>, %arg3: memref<2x1x64xf32, #tpu.memory_space<vmem>>, %arg4: memref<2x64x192xbf16, #tpu.memory_space<vmem>>, %arg5: memref<2x1x192xf32, #tpu.memory_space<vmem>>, %arg6: memref<2x64x64xbf16, #tpu.memory_space<vmem>>, %arg7: memref<2x1x64xf32, #tpu.memory_space<vmem>>, %arg8: memref<2x1x64xf32, #tpu.memory_space<vmem>>, %arg9: memref<2x1x64xf32, #tpu.memory_space<vmem>>, %arg10: memref<2x64x256xbf16, #tpu.memory_space<vmem>>, %arg11: memref<2x1x256xf32, #tpu.memory_space<vmem>>, %arg12: memref<2x256x64xbf16, #tpu.memory_space<vmem>>, %arg13: memref<2x1x64xf32, #tpu.memory_space<vmem>>, %arg14: memref<2x1x64xf32, #tpu.memory_space<vmem>>) attributes {dimension_semantics = [#tpu.dimension_semantics<parallel>], iteration_bounds = array<i64: 1>, scalar_prefetch = 0 : i64, scratch_operands = 0 : i64, tpu.core_type = #tpu.core_type<tc>, window_params = [{transform_indices = @transform_0, window_bounds = array<i64: 2, 8, 64>}, {pipeline_mode = #tpu.pipeline_mode<synchronous>, transform_indices = @transform_1, window_bounds = array<i64: 2, 1, 64>}, {pipeline_mode = #tpu.pipeline_mode<synchronous>, transform_indices = @transform_2, window_bounds = array<i64: 2, 1, 64>}, {pipeline_mode = #tpu.pipeline_mode<synchronous>, transform_indices = @transform_3, window_bounds = array<i64: 2, 64, 192>}, {pipeline_mode = #tpu.pipeline_mode<synchronous>, transform_indices = @transform_4, window_bounds = array<i64: 2, 1, 192>}, {pipeline_mode = #tpu.pipeline_mode<synchronous>, transform_indices = @transform_5, window_bounds = array<i64: 2, 64, 64>}, {pipeline_mode = #tpu.pipeline_mode<synchronous>, transform_indices = @transform_6, window_bounds = array<i64: 2, 1, 64>}, {pipeline_mode = #tpu.pipeline_mode<synchronous>, transform_indices = @transform_7, window_bounds = array<i64: 2, 1, 64>}, {pipeline_mode = #tpu.pipeline_mode<synchronous>, transform_indices = @transform_8, window_bounds = array<i64: 2, 1, 64>}, {pipeline_mode = #tpu.pipeline_mode<synchronous>, transform_indices = @transform_9, window_bounds = array<i64: 2, 64, 256>}, {pipeline_mode = #tpu.pipeline_mode<synchronous>, transform_indices = @transform_10, window_bounds = array<i64: 2, 1, 256>}, {pipeline_mode = #tpu.pipeline_mode<synchronous>, transform_indices = @transform_11, window_bounds = array<i64: 2, 256, 64>}, {pipeline_mode = #tpu.pipeline_mode<synchronous>, transform_indices = @transform_12, window_bounds = array<i64: 2, 1, 64>}, {transform_indices = @transform_13, window_bounds = array<i64: 2, 1, 64>}]} {
    %c0 = arith.constant 0 : index
    %c0_0 = arith.constant 0 : index
    %c0_1 = arith.constant 0 : index
    %0 = vector.load %arg1[%c0, %c0_0, %c0_1] : memref<2x8x64xf32, #tpu.memory_space<vmem>>, vector<2x8x64xf32>
    %1 = vector.shape_cast %0 : vector<2x8x64xf32> to vector<16x64xf32>
    %c0_2 = arith.constant 0 : index
    %c0_3 = arith.constant 0 : index
    %c0_4 = arith.constant 0 : index
    %2 = vector.load %arg2[%c0_2, %c0_3, %c0_4] : memref<2x1x64xf32, #tpu.memory_space<vmem>>, vector<1x1x64xf32>
    %3 = vector.shape_cast %2 : vector<1x1x64xf32> to vector<1x64xf32>
    %c0_5 = arith.constant 0 : index
    %c0_6 = arith.constant 0 : index
    %c0_7 = arith.constant 0 : index
    %4 = vector.load %arg3[%c0_5, %c0_6, %c0_7] : memref<2x1x64xf32, #tpu.memory_space<vmem>>, vector<1x1x64xf32>
    %5 = vector.shape_cast %4 : vector<1x1x64xf32> to vector<1x64xf32>
    %c0_8 = arith.constant 0 : index
    %c0_9 = arith.constant 0 : index
    %c0_10 = arith.constant 0 : index
    %6 = vector.load %arg4[%c0_8, %c0_9, %c0_10] : memref<2x64x192xbf16, #tpu.memory_space<vmem>>, vector<1x64x192xbf16>
    %7 = vector.shape_cast %6 : vector<1x64x192xbf16> to vector<64x192xbf16>
    %c0_11 = arith.constant 0 : index
    %c0_12 = arith.constant 0 : index
    %c0_13 = arith.constant 0 : index
    %8 = vector.load %arg5[%c0_11, %c0_12, %c0_13] : memref<2x1x192xf32, #tpu.memory_space<vmem>>, vector<1x1x192xf32>
    %9 = vector.shape_cast %8 : vector<1x1x192xf32> to vector<1x192xf32>
    %c0_14 = arith.constant 0 : index
    %c0_15 = arith.constant 0 : index
    %c0_16 = arith.constant 0 : index
    %10 = vector.load %arg6[%c0_14, %c0_15, %c0_16] : memref<2x64x64xbf16, #tpu.memory_space<vmem>>, vector<1x64x64xbf16>
    %11 = vector.shape_cast %10 : vector<1x64x64xbf16> to vector<64x64xbf16>
    %c0_17 = arith.constant 0 : index
    %c0_18 = arith.constant 0 : index
    %c0_19 = arith.constant 0 : index
    %12 = vector.load %arg7[%c0_17, %c0_18, %c0_19] : memref<2x1x64xf32, #tpu.memory_space<vmem>>, vector<1x1x64xf32>
    %13 = vector.shape_cast %12 : vector<1x1x64xf32> to vector<1x64xf32>
    %c0_20 = arith.constant 0 : index
    %c0_21 = arith.constant 0 : index
    %c0_22 = arith.constant 0 : index
    %14 = vector.load %arg8[%c0_20, %c0_21, %c0_22] : memref<2x1x64xf32, #tpu.memory_space<vmem>>, vector<1x1x64xf32>
    %15 = vector.shape_cast %14 : vector<1x1x64xf32> to vector<1x64xf32>
    %c0_23 = arith.constant 0 : index
    %c0_24 = arith.constant 0 : index
    %c0_25 = arith.constant 0 : index
    %16 = vector.load %arg9[%c0_23, %c0_24, %c0_25] : memref<2x1x64xf32, #tpu.memory_space<vmem>>, vector<1x1x64xf32>
    %17 = vector.shape_cast %16 : vector<1x1x64xf32> to vector<1x64xf32>
    %c0_26 = arith.constant 0 : index
    %c0_27 = arith.constant 0 : index
    %c0_28 = arith.constant 0 : index
    %18 = vector.load %arg10[%c0_26, %c0_27, %c0_28] : memref<2x64x256xbf16, #tpu.memory_space<vmem>>, vector<1x64x256xbf16>
    %19 = vector.shape_cast %18 : vector<1x64x256xbf16> to vector<64x256xbf16>
    %c0_29 = arith.constant 0 : index
    %c0_30 = arith.constant 0 : index
    %c0_31 = arith.constant 0 : index
    %20 = vector.load %arg11[%c0_29, %c0_30, %c0_31] : memref<2x1x256xf32, #tpu.memory_space<vmem>>, vector<1x1x256xf32>
    %21 = vector.shape_cast %20 : vector<1x1x256xf32> to vector<1x256xf32>
    %c0_32 = arith.constant 0 : index
    %c0_33 = arith.constant 0 : index
    %c0_34 = arith.constant 0 : index
    %22 = vector.load %arg12[%c0_32, %c0_33, %c0_34] : memref<2x256x64xbf16, #tpu.memory_space<vmem>>, vector<1x256x64xbf16>
    %23 = vector.shape_cast %22 : vector<1x256x64xbf16> to vector<256x64xbf16>
    %c0_35 = arith.constant 0 : index
    %c0_36 = arith.constant 0 : index
    %c0_37 = arith.constant 0 : index
    %24 = vector.load %arg13[%c0_35, %c0_36, %c0_37] : memref<2x1x64xf32, #tpu.memory_space<vmem>>, vector<1x1x64xf32>
    %25 = vector.shape_cast %24 : vector<1x1x64xf32> to vector<1x64xf32>
    %cst = arith.constant dense<0.000000e+00> : vector<16xf32>
    %26 = vector.multi_reduction <add>, %1, %cst [1] : vector<16x64xf32> to vector<16xf32>
    %27 = vector.shape_cast %26 : vector<16xf32> to vector<16x1xf32>
    %cst_38 = arith.constant 6.400000e+01 : f32
    %28 = vector.broadcast %cst_38 : f32 to vector<16x1xf32>
    %29 = arith.divf %27, %28 : vector<16x1xf32>
    %30 = vector.broadcast %29 : vector<16x1xf32> to vector<16x64xf32>
    %31 = arith.subf %1, %30 : vector<16x64xf32>
    %32 = arith.mulf %31, %31 : vector<16x64xf32>
    %cst_39 = arith.constant dense<0.000000e+00> : vector<16xf32>
    %33 = vector.multi_reduction <add>, %32, %cst_39 [1] : vector<16x64xf32> to vector<16xf32>
    %34 = vector.shape_cast %33 : vector<16xf32> to vector<16x1xf32>
    %cst_40 = arith.constant 6.400000e+01 : f32
    %35 = vector.broadcast %cst_40 : f32 to vector<16x1xf32>
    %36 = arith.divf %34, %35 : vector<16x1xf32>
    %cst_41 = arith.constant 9.99999974E-6 : f32
    %37 = vector.broadcast %cst_41 : f32 to vector<16x1xf32>
    %38 = arith.addf %36, %37 : vector<16x1xf32>
    %39 = math.rsqrt %38 : vector<16x1xf32>
    %40 = vector.broadcast %39 : vector<16x1xf32> to vector<16x64xf32>
    %41 = arith.mulf %31, %40 : vector<16x64xf32>
    %42 = vector.broadcast %3 : vector<1x64xf32> to vector<16x64xf32>
    %43 = arith.mulf %41, %42 : vector<16x64xf32>
    %44 = vector.broadcast %5 : vector<1x64xf32> to vector<16x64xf32>
    %45 = arith.addf %43, %44 : vector<16x64xf32>
    %46 = arith.truncf %45 : vector<16x64xf32> to vector<16x64xbf16>
    %cst_42 = arith.constant dense<0.000000e+00> : vector<16x192xf32>
    %47 = tpu.matmul %46, %7, %cst_42 {dimension_numbers = #tpu.dot_dimension_numbers<[1], [0], [0], [1], [0, 0, 1, 1], [], []>} : vector<16x64xbf16>, vector<64x192xbf16>, vector<16x192xf32> -> vector<16x192xf32>
    %48 = vector.broadcast %9 : vector<1x192xf32> to vector<16x192xf32>
    %49 = arith.addf %47, %48 : vector<16x192xf32>
    %50 = vector.extract_strided_slice %49 {offsets = [0, 0], sizes = [16, 64], strides = [1, 1]} : vector<16x192xf32> to vector<16x64xf32>
    %51 = vector.shape_cast %50 : vector<16x64xf32> to vector<2x8x64xf32>
    %52 = arith.truncf %51 : vector<2x8x64xf32> to vector<2x8x64xbf16>
    %53 = vector.extract_strided_slice %49 {offsets = [0, 64], sizes = [16, 64], strides = [1, 1]} : vector<16x192xf32> to vector<16x64xf32>
    %54 = vector.shape_cast %53 : vector<16x64xf32> to vector<2x8x64xf32>
    %55 = arith.truncf %54 : vector<2x8x64xf32> to vector<2x8x64xbf16>
    %56 = vector.extract_strided_slice %49 {offsets = [0, 128], sizes = [16, 64], strides = [1, 1]} : vector<16x192xf32> to vector<16x64xf32>
    %57 = vector.shape_cast %56 : vector<16x64xf32> to vector<2x8x64xf32>
    %58 = arith.truncf %57 : vector<2x8x64xf32> to vector<2x8x64xbf16>
    %59 = vector.extract_strided_slice %52 {offsets = [0, 0, 0], sizes = [2, 8, 16], strides = [1, 1, 1]} : vector<2x8x64xbf16> to vector<2x8x16xbf16>
    %60 = vector.extract_strided_slice %55 {offsets = [0, 0, 0], sizes = [2, 8, 16], strides = [1, 1, 1]} : vector<2x8x64xbf16> to vector<2x8x16xbf16>
    "tpu.trace_start"() <{level = 10 : i32, message = "bqd,bkd->bqk"}> : () -> ()
    %cst_43 = arith.constant dense<0.000000e+00> : vector<2x8x8xf32>
    %61 = tpu.matmul %59, %60, %cst_43 {dimension_numbers = #tpu.dot_dimension_numbers<[2], [2], [1], [1], [0, 0, 0, 1, 1, 1], [0], [0]>} : vector<2x8x16xbf16>, vector<2x8x16xbf16>, vector<2x8x8xf32> -> vector<2x8x8xf32>
    "tpu.trace_stop"() : () -> ()
    %cst_44 = arith.constant dense<0xFF800000> : vector<2x8xf32>
    %62 = vector.multi_reduction <maximumf>, %61, %cst_44 [2] : vector<2x8x8xf32> to vector<2x8xf32>
    %63 = vector.shape_cast %62 : vector<2x8xf32> to vector<2x8x1xf32>
    %64 = vector.broadcast %63 : vector<2x8x1xf32> to vector<2x8x8xf32>
    %65 = arith.subf %61, %64 : vector<2x8x8xf32>
    %66 = math.exp %65 : vector<2x8x8xf32>
    %cst_45 = arith.constant dense<0.000000e+00> : vector<2x8xf32>
    %67 = vector.multi_reduction <add>, %66, %cst_45 [2] : vector<2x8x8xf32> to vector<2x8xf32>
    %68 = vector.shape_cast %67 : vector<2x8xf32> to vector<2x8x1xf32>
    %69 = vector.broadcast %68 : vector<2x8x1xf32> to vector<2x8x8xf32>
    %70 = arith.divf %66, %69 : vector<2x8x8xf32>
    %71 = arith.truncf %70 : vector<2x8x8xf32> to vector<2x8x8xbf16>
    %72 = vector.extract_strided_slice %58 {offsets = [0, 0, 0], sizes = [2, 8, 16], strides = [1, 1, 1]} : vector<2x8x64xbf16> to vector<2x8x16xbf16>
    "tpu.trace_start"() <{level = 10 : i32, message = "bqk,bkd->bqd"}> : () -> ()
    %cst_46 = arith.constant dense<0.000000e+00> : vector<2x8x16xf32>
    %73 = tpu.matmul %71, %72, %cst_46 {dimension_numbers = #tpu.dot_dimension_numbers<[2], [1], [1], [2], [0, 0, 0, 1, 1, 2], [0], [0]>} : vector<2x8x8xbf16>, vector<2x8x16xbf16>, vector<2x8x16xf32> -> vector<2x8x16xf32>
    "tpu.trace_stop"() : () -> ()
    %74 = vector.extract_strided_slice %52 {offsets = [0, 0, 16], sizes = [2, 8, 16], strides = [1, 1, 1]} : vector<2x8x64xbf16> to vector<2x8x16xbf16>
    %75 = vector.extract_strided_slice %55 {offsets = [0, 0, 16], sizes = [2, 8, 16], strides = [1, 1, 1]} : vector<2x8x64xbf16> to vector<2x8x16xbf16>
    "tpu.trace_start"() <{level = 10 : i32, message = "bqd,bkd->bqk"}> : () -> ()
    %cst_47 = arith.constant dense<0.000000e+00> : vector<2x8x8xf32>
    %76 = tpu.matmul %74, %75, %cst_47 {dimension_numbers = #tpu.dot_dimension_numbers<[2], [2], [1], [1], [0, 0, 0, 1, 1, 1], [0], [0]>} : vector<2x8x16xbf16>, vector<2x8x16xbf16>, vector<2x8x8xf32> -> vector<2x8x8xf32>
    "tpu.trace_stop"() : () -> ()
    %cst_48 = arith.constant dense<0xFF800000> : vector<2x8xf32>
    %77 = vector.multi_reduction <maximumf>, %76, %cst_48 [2] : vector<2x8x8xf32> to vector<2x8xf32>
    %78 = vector.shape_cast %77 : vector<2x8xf32> to vector<2x8x1xf32>
    %79 = vector.broadcast %78 : vector<2x8x1xf32> to vector<2x8x8xf32>
    %80 = arith.subf %76, %79 : vector<2x8x8xf32>
    %81 = math.exp %80 : vector<2x8x8xf32>
    %cst_49 = arith.constant dense<0.000000e+00> : vector<2x8xf32>
    %82 = vector.multi_reduction <add>, %81, %cst_49 [2] : vector<2x8x8xf32> to vector<2x8xf32>
    %83 = vector.shape_cast %82 : vector<2x8xf32> to vector<2x8x1xf32>
    %84 = vector.broadcast %83 : vector<2x8x1xf32> to vector<2x8x8xf32>
    %85 = arith.divf %81, %84 : vector<2x8x8xf32>
    %86 = arith.truncf %85 : vector<2x8x8xf32> to vector<2x8x8xbf16>
    %87 = vector.extract_strided_slice %58 {offsets = [0, 0, 16], sizes = [2, 8, 16], strides = [1, 1, 1]} : vector<2x8x64xbf16> to vector<2x8x16xbf16>
    "tpu.trace_start"() <{level = 10 : i32, message = "bqk,bkd->bqd"}> : () -> ()
    %cst_50 = arith.constant dense<0.000000e+00> : vector<2x8x16xf32>
    %88 = tpu.matmul %86, %87, %cst_50 {dimension_numbers = #tpu.dot_dimension_numbers<[2], [1], [1], [2], [0, 0, 0, 1, 1, 2], [0], [0]>} : vector<2x8x8xbf16>, vector<2x8x16xbf16>, vector<2x8x16xf32> -> vector<2x8x16xf32>
    "tpu.trace_stop"() : () -> ()
    %89 = vector.extract_strided_slice %52 {offsets = [0, 0, 32], sizes = [2, 8, 16], strides = [1, 1, 1]} : vector<2x8x64xbf16> to vector<2x8x16xbf16>
    %90 = vector.extract_strided_slice %55 {offsets = [0, 0, 32], sizes = [2, 8, 16], strides = [1, 1, 1]} : vector<2x8x64xbf16> to vector<2x8x16xbf16>
    "tpu.trace_start"() <{level = 10 : i32, message = "bqd,bkd->bqk"}> : () -> ()
    %cst_51 = arith.constant dense<0.000000e+00> : vector<2x8x8xf32>
    %91 = tpu.matmul %89, %90, %cst_51 {dimension_numbers = #tpu.dot_dimension_numbers<[2], [2], [1], [1], [0, 0, 0, 1, 1, 1], [0], [0]>} : vector<2x8x16xbf16>, vector<2x8x16xbf16>, vector<2x8x8xf32> -> vector<2x8x8xf32>
    "tpu.trace_stop"() : () -> ()
    %cst_52 = arith.constant dense<0xFF800000> : vector<2x8xf32>
    %92 = vector.multi_reduction <maximumf>, %91, %cst_52 [2] : vector<2x8x8xf32> to vector<2x8xf32>
    %93 = vector.shape_cast %92 : vector<2x8xf32> to vector<2x8x1xf32>
    %94 = vector.broadcast %93 : vector<2x8x1xf32> to vector<2x8x8xf32>
    %95 = arith.subf %91, %94 : vector<2x8x8xf32>
    %96 = math.exp %95 : vector<2x8x8xf32>
    %cst_53 = arith.constant dense<0.000000e+00> : vector<2x8xf32>
    %97 = vector.multi_reduction <add>, %96, %cst_53 [2] : vector<2x8x8xf32> to vector<2x8xf32>
    %98 = vector.shape_cast %97 : vector<2x8xf32> to vector<2x8x1xf32>
    %99 = vector.broadcast %98 : vector<2x8x1xf32> to vector<2x8x8xf32>
    %100 = arith.divf %96, %99 : vector<2x8x8xf32>
    %101 = arith.truncf %100 : vector<2x8x8xf32> to vector<2x8x8xbf16>
    %102 = vector.extract_strided_slice %58 {offsets = [0, 0, 32], sizes = [2, 8, 16], strides = [1, 1, 1]} : vector<2x8x64xbf16> to vector<2x8x16xbf16>
    "tpu.trace_start"() <{level = 10 : i32, message = "bqk,bkd->bqd"}> : () -> ()
    %cst_54 = arith.constant dense<0.000000e+00> : vector<2x8x16xf32>
    %103 = tpu.matmul %101, %102, %cst_54 {dimension_numbers = #tpu.dot_dimension_numbers<[2], [1], [1], [2], [0, 0, 0, 1, 1, 2], [0], [0]>} : vector<2x8x8xbf16>, vector<2x8x16xbf16>, vector<2x8x16xf32> -> vector<2x8x16xf32>
    "tpu.trace_stop"() : () -> ()
    %104 = vector.extract_strided_slice %52 {offsets = [0, 0, 48], sizes = [2, 8, 16], strides = [1, 1, 1]} : vector<2x8x64xbf16> to vector<2x8x16xbf16>
    %105 = vector.extract_strided_slice %55 {offsets = [0, 0, 48], sizes = [2, 8, 16], strides = [1, 1, 1]} : vector<2x8x64xbf16> to vector<2x8x16xbf16>
    "tpu.trace_start"() <{level = 10 : i32, message = "bqd,bkd->bqk"}> : () -> ()
    %cst_55 = arith.constant dense<0.000000e+00> : vector<2x8x8xf32>
    %106 = tpu.matmul %104, %105, %cst_55 {dimension_numbers = #tpu.dot_dimension_numbers<[2], [2], [1], [1], [0, 0, 0, 1, 1, 1], [0], [0]>} : vector<2x8x16xbf16>, vector<2x8x16xbf16>, vector<2x8x8xf32> -> vector<2x8x8xf32>
    "tpu.trace_stop"() : () -> ()
    %cst_56 = arith.constant dense<0xFF800000> : vector<2x8xf32>
    %107 = vector.multi_reduction <maximumf>, %106, %cst_56 [2] : vector<2x8x8xf32> to vector<2x8xf32>
    %108 = vector.shape_cast %107 : vector<2x8xf32> to vector<2x8x1xf32>
    %109 = vector.broadcast %108 : vector<2x8x1xf32> to vector<2x8x8xf32>
    %110 = arith.subf %106, %109 : vector<2x8x8xf32>
    %111 = math.exp %110 : vector<2x8x8xf32>
    %cst_57 = arith.constant dense<0.000000e+00> : vector<2x8xf32>
    %112 = vector.multi_reduction <add>, %111, %cst_57 [2] : vector<2x8x8xf32> to vector<2x8xf32>
    %113 = vector.shape_cast %112 : vector<2x8xf32> to vector<2x8x1xf32>
    %114 = vector.broadcast %113 : vector<2x8x1xf32> to vector<2x8x8xf32>
    %115 = arith.divf %111, %114 : vector<2x8x8xf32>
    %116 = arith.truncf %115 : vector<2x8x8xf32> to vector<2x8x8xbf16>
    %117 = vector.extract_strided_slice %58 {offsets = [0, 0, 48], sizes = [2, 8, 16], strides = [1, 1, 1]} : vector<2x8x64xbf16> to vector<2x8x16xbf16>
    "tpu.trace_start"() <{level = 10 : i32, message = "bqk,bkd->bqd"}> : () -> ()
    %cst_58 = arith.constant dense<0.000000e+00> : vector<2x8x16xf32>
    %118 = tpu.matmul %116, %117, %cst_58 {dimension_numbers = #tpu.dot_dimension_numbers<[2], [1], [1], [2], [0, 0, 0, 1, 1, 2], [0], [0]>} : vector<2x8x8xbf16>, vector<2x8x16xbf16>, vector<2x8x16xf32> -> vector<2x8x16xf32>
    "tpu.trace_stop"() : () -> ()
    %119 = tpu.concatenate %73, %88, %103, %118 in 2 : vector<2x8x16xf32>, vector<2x8x16xf32>, vector<2x8x16xf32>, vector<2x8x16xf32> -> vector<2x8x64xf32>
    %120 = vector.shape_cast %119 : vector<2x8x64xf32> to vector<16x64xf32>
    %121 = arith.truncf %120 : vector<16x64xf32> to vector<16x64xbf16>
    %cst_59 = arith.constant dense<0.000000e+00> : vector<16x64xf32>
    %122 = tpu.matmul %121, %11, %cst_59 {dimension_numbers = #tpu.dot_dimension_numbers<[1], [0], [0], [1], [0, 0, 1, 1], [], []>} : vector<16x64xbf16>, vector<64x64xbf16>, vector<16x64xf32> -> vector<16x64xf32>
    %123 = arith.addf %1, %122 : vector<16x64xf32>
    %124 = vector.broadcast %13 : vector<1x64xf32> to vector<16x64xf32>
    %125 = arith.addf %123, %124 : vector<16x64xf32>
    %cst_60 = arith.constant dense<0.000000e+00> : vector<16xf32>
    %126 = vector.multi_reduction <add>, %125, %cst_60 [1] : vector<16x64xf32> to vector<16xf32>
    %127 = vector.shape_cast %126 : vector<16xf32> to vector<16x1xf32>
    %cst_61 = arith.constant 6.400000e+01 : f32
    %128 = vector.broadcast %cst_61 : f32 to vector<16x1xf32>
    %129 = arith.divf %127, %128 : vector<16x1xf32>
    %130 = vector.broadcast %129 : vector<16x1xf32> to vector<16x64xf32>
    %131 = arith.subf %125, %130 : vector<16x64xf32>
    %132 = arith.mulf %131, %131 : vector<16x64xf32>
    %cst_62 = arith.constant dense<0.000000e+00> : vector<16xf32>
    %133 = vector.multi_reduction <add>, %132, %cst_62 [1] : vector<16x64xf32> to vector<16xf32>
    %134 = vector.shape_cast %133 : vector<16xf32> to vector<16x1xf32>
    %cst_63 = arith.constant 6.400000e+01 : f32
    %135 = vector.broadcast %cst_63 : f32 to vector<16x1xf32>
    %136 = arith.divf %134, %135 : vector<16x1xf32>
    %cst_64 = arith.constant 9.99999974E-6 : f32
    %137 = vector.broadcast %cst_64 : f32 to vector<16x1xf32>
    %138 = arith.addf %136, %137 : vector<16x1xf32>
    %139 = math.rsqrt %138 : vector<16x1xf32>
    %140 = vector.broadcast %139 : vector<16x1xf32> to vector<16x64xf32>
    %141 = arith.mulf %131, %140 : vector<16x64xf32>
    %142 = vector.broadcast %15 : vector<1x64xf32> to vector<16x64xf32>
    %143 = arith.mulf %141, %142 : vector<16x64xf32>
    %144 = vector.broadcast %17 : vector<1x64xf32> to vector<16x64xf32>
    %145 = arith.addf %143, %144 : vector<16x64xf32>
    %146 = arith.truncf %145 : vector<16x64xf32> to vector<16x64xbf16>
    %cst_65 = arith.constant dense<0.000000e+00> : vector<16x256xf32>
    %147 = tpu.matmul %146, %19, %cst_65 {dimension_numbers = #tpu.dot_dimension_numbers<[1], [0], [0], [1], [0, 0, 1, 1], [], []>} : vector<16x64xbf16>, vector<64x256xbf16>, vector<16x256xf32> -> vector<16x256xf32>
    %148 = vector.broadcast %21 : vector<1x256xf32> to vector<16x256xf32>
    %149 = arith.addf %147, %148 : vector<16x256xf32>
    %cst_66 = arith.constant 1.702000e+00 : f32
    %150 = vector.broadcast %cst_66 : f32 to vector<16x256xf32>
    %151 = arith.mulf %150, %149 : vector<16x256xf32>
    %152 = arith.negf %151 : vector<16x256xf32>
    %153 = math.exp %152 : vector<16x256xf32>
    %cst_67 = arith.constant 1.000000e+00 : f32
    %154 = vector.broadcast %cst_67 : f32 to vector<16x256xf32>
    %155 = arith.addf %154, %153 : vector<16x256xf32>
    %156 = arith.divf %154, %155 : vector<16x256xf32>
    %157 = arith.mulf %149, %156 : vector<16x256xf32>
    %158 = arith.truncf %157 : vector<16x256xf32> to vector<16x256xbf16>
    %cst_68 = arith.constant dense<0.000000e+00> : vector<16x64xf32>
    %159 = tpu.matmul %158, %23, %cst_68 {dimension_numbers = #tpu.dot_dimension_numbers<[1], [0], [0], [1], [0, 0, 1, 1], [], []>} : vector<16x256xbf16>, vector<256x64xbf16>, vector<16x64xf32> -> vector<16x64xf32>
    %160 = arith.addf %125, %159 : vector<16x64xf32>
    %161 = vector.broadcast %25 : vector<1x64xf32> to vector<16x64xf32>
    %162 = arith.addf %160, %161 : vector<16x64xf32>
    %c1 = arith.constant 1 : index
    %c0_69 = arith.constant 0 : index
    %c0_70 = arith.constant 0 : index
    %163 = vector.load %arg2[%c1, %c0_69, %c0_70] : memref<2x1x64xf32, #tpu.memory_space<vmem>>, vector<1x1x64xf32>
    %164 = vector.shape_cast %163 : vector<1x1x64xf32> to vector<1x64xf32>
    %c1_71 = arith.constant 1 : index
    %c0_72 = arith.constant 0 : index
    %c0_73 = arith.constant 0 : index
    %165 = vector.load %arg3[%c1_71, %c0_72, %c0_73] : memref<2x1x64xf32, #tpu.memory_space<vmem>>, vector<1x1x64xf32>
    %166 = vector.shape_cast %165 : vector<1x1x64xf32> to vector<1x64xf32>
    %c1_74 = arith.constant 1 : index
    %c0_75 = arith.constant 0 : index
    %c0_76 = arith.constant 0 : index
    %167 = vector.load %arg4[%c1_74, %c0_75, %c0_76] : memref<2x64x192xbf16, #tpu.memory_space<vmem>>, vector<1x64x192xbf16>
    %168 = vector.shape_cast %167 : vector<1x64x192xbf16> to vector<64x192xbf16>
    %c1_77 = arith.constant 1 : index
    %c0_78 = arith.constant 0 : index
    %c0_79 = arith.constant 0 : index
    %169 = vector.load %arg5[%c1_77, %c0_78, %c0_79] : memref<2x1x192xf32, #tpu.memory_space<vmem>>, vector<1x1x192xf32>
    %170 = vector.shape_cast %169 : vector<1x1x192xf32> to vector<1x192xf32>
    %c1_80 = arith.constant 1 : index
    %c0_81 = arith.constant 0 : index
    %c0_82 = arith.constant 0 : index
    %171 = vector.load %arg6[%c1_80, %c0_81, %c0_82] : memref<2x64x64xbf16, #tpu.memory_space<vmem>>, vector<1x64x64xbf16>
    %172 = vector.shape_cast %171 : vector<1x64x64xbf16> to vector<64x64xbf16>
    %c1_83 = arith.constant 1 : index
    %c0_84 = arith.constant 0 : index
    %c0_85 = arith.constant 0 : index
    %173 = vector.load %arg7[%c1_83, %c0_84, %c0_85] : memref<2x1x64xf32, #tpu.memory_space<vmem>>, vector<1x1x64xf32>
    %174 = vector.shape_cast %173 : vector<1x1x64xf32> to vector<1x64xf32>
    %c1_86 = arith.constant 1 : index
    %c0_87 = arith.constant 0 : index
    %c0_88 = arith.constant 0 : index
    %175 = vector.load %arg8[%c1_86, %c0_87, %c0_88] : memref<2x1x64xf32, #tpu.memory_space<vmem>>, vector<1x1x64xf32>
    %176 = vector.shape_cast %175 : vector<1x1x64xf32> to vector<1x64xf32>
    %c1_89 = arith.constant 1 : index
    %c0_90 = arith.constant 0 : index
    %c0_91 = arith.constant 0 : index
    %177 = vector.load %arg9[%c1_89, %c0_90, %c0_91] : memref<2x1x64xf32, #tpu.memory_space<vmem>>, vector<1x1x64xf32>
    %178 = vector.shape_cast %177 : vector<1x1x64xf32> to vector<1x64xf32>
    %c1_92 = arith.constant 1 : index
    %c0_93 = arith.constant 0 : index
    %c0_94 = arith.constant 0 : index
    %179 = vector.load %arg10[%c1_92, %c0_93, %c0_94] : memref<2x64x256xbf16, #tpu.memory_space<vmem>>, vector<1x64x256xbf16>
    %180 = vector.shape_cast %179 : vector<1x64x256xbf16> to vector<64x256xbf16>
    %c1_95 = arith.constant 1 : index
    %c0_96 = arith.constant 0 : index
    %c0_97 = arith.constant 0 : index
    %181 = vector.load %arg11[%c1_95, %c0_96, %c0_97] : memref<2x1x256xf32, #tpu.memory_space<vmem>>, vector<1x1x256xf32>
    %182 = vector.shape_cast %181 : vector<1x1x256xf32> to vector<1x256xf32>
    %c1_98 = arith.constant 1 : index
    %c0_99 = arith.constant 0 : index
    %c0_100 = arith.constant 0 : index
    %183 = vector.load %arg12[%c1_98, %c0_99, %c0_100] : memref<2x256x64xbf16, #tpu.memory_space<vmem>>, vector<1x256x64xbf16>
    %184 = vector.shape_cast %183 : vector<1x256x64xbf16> to vector<256x64xbf16>
    %c1_101 = arith.constant 1 : index
    %c0_102 = arith.constant 0 : index
    %c0_103 = arith.constant 0 : index
    %185 = vector.load %arg13[%c1_101, %c0_102, %c0_103] : memref<2x1x64xf32, #tpu.memory_space<vmem>>, vector<1x1x64xf32>
    %186 = vector.shape_cast %185 : vector<1x1x64xf32> to vector<1x64xf32>
    %cst_104 = arith.constant dense<0.000000e+00> : vector<16xf32>
    %187 = vector.multi_reduction <add>, %162, %cst_104 [1] : vector<16x64xf32> to vector<16xf32>
    %188 = vector.shape_cast %187 : vector<16xf32> to vector<16x1xf32>
    %cst_105 = arith.constant 6.400000e+01 : f32
    %189 = vector.broadcast %cst_105 : f32 to vector<16x1xf32>
    %190 = arith.divf %188, %189 : vector<16x1xf32>
    %191 = vector.broadcast %190 : vector<16x1xf32> to vector<16x64xf32>
    %192 = arith.subf %162, %191 : vector<16x64xf32>
    %193 = arith.mulf %192, %192 : vector<16x64xf32>
    %cst_106 = arith.constant dense<0.000000e+00> : vector<16xf32>
    %194 = vector.multi_reduction <add>, %193, %cst_106 [1] : vector<16x64xf32> to vector<16xf32>
    %195 = vector.shape_cast %194 : vector<16xf32> to vector<16x1xf32>
    %cst_107 = arith.constant 6.400000e+01 : f32
    %196 = vector.broadcast %cst_107 : f32 to vector<16x1xf32>
    %197 = arith.divf %195, %196 : vector<16x1xf32>
    %cst_108 = arith.constant 9.99999974E-6 : f32
    %198 = vector.broadcast %cst_108 : f32 to vector<16x1xf32>
    %199 = arith.addf %197, %198 : vector<16x1xf32>
    %200 = math.rsqrt %199 : vector<16x1xf32>
    %201 = vector.broadcast %200 : vector<16x1xf32> to vector<16x64xf32>
    %202 = arith.mulf %192, %201 : vector<16x64xf32>
    %203 = vector.broadcast %164 : vector<1x64xf32> to vector<16x64xf32>
    %204 = arith.mulf %202, %203 : vector<16x64xf32>
    %205 = vector.broadcast %166 : vector<1x64xf32> to vector<16x64xf32>
    %206 = arith.addf %204, %205 : vector<16x64xf32>
    %207 = arith.truncf %206 : vector<16x64xf32> to vector<16x64xbf16>
    %cst_109 = arith.constant dense<0.000000e+00> : vector<16x192xf32>
    %208 = tpu.matmul %207, %168, %cst_109 {dimension_numbers = #tpu.dot_dimension_numbers<[1], [0], [0], [1], [0, 0, 1, 1], [], []>} : vector<16x64xbf16>, vector<64x192xbf16>, vector<16x192xf32> -> vector<16x192xf32>
    %209 = vector.broadcast %170 : vector<1x192xf32> to vector<16x192xf32>
    %210 = arith.addf %208, %209 : vector<16x192xf32>
    %211 = vector.extract_strided_slice %210 {offsets = [0, 0], sizes = [16, 64], strides = [1, 1]} : vector<16x192xf32> to vector<16x64xf32>
    %212 = vector.shape_cast %211 : vector<16x64xf32> to vector<2x8x64xf32>
    %213 = arith.truncf %212 : vector<2x8x64xf32> to vector<2x8x64xbf16>
    %214 = vector.extract_strided_slice %210 {offsets = [0, 64], sizes = [16, 64], strides = [1, 1]} : vector<16x192xf32> to vector<16x64xf32>
    %215 = vector.shape_cast %214 : vector<16x64xf32> to vector<2x8x64xf32>
    %216 = arith.truncf %215 : vector<2x8x64xf32> to vector<2x8x64xbf16>
    %217 = vector.extract_strided_slice %210 {offsets = [0, 128], sizes = [16, 64], strides = [1, 1]} : vector<16x192xf32> to vector<16x64xf32>
    %218 = vector.shape_cast %217 : vector<16x64xf32> to vector<2x8x64xf32>
    %219 = arith.truncf %218 : vector<2x8x64xf32> to vector<2x8x64xbf16>
    %220 = vector.extract_strided_slice %213 {offsets = [0, 0, 0], sizes = [2, 8, 16], strides = [1, 1, 1]} : vector<2x8x64xbf16> to vector<2x8x16xbf16>
    %221 = vector.extract_strided_slice %216 {offsets = [0, 0, 0], sizes = [2, 8, 16], strides = [1, 1, 1]} : vector<2x8x64xbf16> to vector<2x8x16xbf16>
    "tpu.trace_start"() <{level = 10 : i32, message = "bqd,bkd->bqk"}> : () -> ()
    %cst_110 = arith.constant dense<0.000000e+00> : vector<2x8x8xf32>
    %222 = tpu.matmul %220, %221, %cst_110 {dimension_numbers = #tpu.dot_dimension_numbers<[2], [2], [1], [1], [0, 0, 0, 1, 1, 1], [0], [0]>} : vector<2x8x16xbf16>, vector<2x8x16xbf16>, vector<2x8x8xf32> -> vector<2x8x8xf32>
    "tpu.trace_stop"() : () -> ()
    %cst_111 = arith.constant dense<0xFF800000> : vector<2x8xf32>
    %223 = vector.multi_reduction <maximumf>, %222, %cst_111 [2] : vector<2x8x8xf32> to vector<2x8xf32>
    %224 = vector.shape_cast %223 : vector<2x8xf32> to vector<2x8x1xf32>
    %225 = vector.broadcast %224 : vector<2x8x1xf32> to vector<2x8x8xf32>
    %226 = arith.subf %222, %225 : vector<2x8x8xf32>
    %227 = math.exp %226 : vector<2x8x8xf32>
    %cst_112 = arith.constant dense<0.000000e+00> : vector<2x8xf32>
    %228 = vector.multi_reduction <add>, %227, %cst_112 [2] : vector<2x8x8xf32> to vector<2x8xf32>
    %229 = vector.shape_cast %228 : vector<2x8xf32> to vector<2x8x1xf32>
    %230 = vector.broadcast %229 : vector<2x8x1xf32> to vector<2x8x8xf32>
    %231 = arith.divf %227, %230 : vector<2x8x8xf32>
    %232 = arith.truncf %231 : vector<2x8x8xf32> to vector<2x8x8xbf16>
    %233 = vector.extract_strided_slice %219 {offsets = [0, 0, 0], sizes = [2, 8, 16], strides = [1, 1, 1]} : vector<2x8x64xbf16> to vector<2x8x16xbf16>
    "tpu.trace_start"() <{level = 10 : i32, message = "bqk,bkd->bqd"}> : () -> ()
    %cst_113 = arith.constant dense<0.000000e+00> : vector<2x8x16xf32>
    %234 = tpu.matmul %232, %233, %cst_113 {dimension_numbers = #tpu.dot_dimension_numbers<[2], [1], [1], [2], [0, 0, 0, 1, 1, 2], [0], [0]>} : vector<2x8x8xbf16>, vector<2x8x16xbf16>, vector<2x8x16xf32> -> vector<2x8x16xf32>
    "tpu.trace_stop"() : () -> ()
    %235 = vector.extract_strided_slice %213 {offsets = [0, 0, 16], sizes = [2, 8, 16], strides = [1, 1, 1]} : vector<2x8x64xbf16> to vector<2x8x16xbf16>
    %236 = vector.extract_strided_slice %216 {offsets = [0, 0, 16], sizes = [2, 8, 16], strides = [1, 1, 1]} : vector<2x8x64xbf16> to vector<2x8x16xbf16>
    "tpu.trace_start"() <{level = 10 : i32, message = "bqd,bkd->bqk"}> : () -> ()
    %cst_114 = arith.constant dense<0.000000e+00> : vector<2x8x8xf32>
    %237 = tpu.matmul %235, %236, %cst_114 {dimension_numbers = #tpu.dot_dimension_numbers<[2], [2], [1], [1], [0, 0, 0, 1, 1, 1], [0], [0]>} : vector<2x8x16xbf16>, vector<2x8x16xbf16>, vector<2x8x8xf32> -> vector<2x8x8xf32>
    "tpu.trace_stop"() : () -> ()
    %cst_115 = arith.constant dense<0xFF800000> : vector<2x8xf32>
    %238 = vector.multi_reduction <maximumf>, %237, %cst_115 [2] : vector<2x8x8xf32> to vector<2x8xf32>
    %239 = vector.shape_cast %238 : vector<2x8xf32> to vector<2x8x1xf32>
    %240 = vector.broadcast %239 : vector<2x8x1xf32> to vector<2x8x8xf32>
    %241 = arith.subf %237, %240 : vector<2x8x8xf32>
    %242 = math.exp %241 : vector<2x8x8xf32>
    %cst_116 = arith.constant dense<0.000000e+00> : vector<2x8xf32>
    %243 = vector.multi_reduction <add>, %242, %cst_116 [2] : vector<2x8x8xf32> to vector<2x8xf32>
    %244 = vector.shape_cast %243 : vector<2x8xf32> to vector<2x8x1xf32>
    %245 = vector.broadcast %244 : vector<2x8x1xf32> to vector<2x8x8xf32>
    %246 = arith.divf %242, %245 : vector<2x8x8xf32>
    %247 = arith.truncf %246 : vector<2x8x8xf32> to vector<2x8x8xbf16>
    %248 = vector.extract_strided_slice %219 {offsets = [0, 0, 16], sizes = [2, 8, 16], strides = [1, 1, 1]} : vector<2x8x64xbf16> to vector<2x8x16xbf16>
    "tpu.trace_start"() <{level = 10 : i32, message = "bqk,bkd->bqd"}> : () -> ()
    %cst_117 = arith.constant dense<0.000000e+00> : vector<2x8x16xf32>
    %249 = tpu.matmul %247, %248, %cst_117 {dimension_numbers = #tpu.dot_dimension_numbers<[2], [1], [1], [2], [0, 0, 0, 1, 1, 2], [0], [0]>} : vector<2x8x8xbf16>, vector<2x8x16xbf16>, vector<2x8x16xf32> -> vector<2x8x16xf32>
    "tpu.trace_stop"() : () -> ()
    %250 = vector.extract_strided_slice %213 {offsets = [0, 0, 32], sizes = [2, 8, 16], strides = [1, 1, 1]} : vector<2x8x64xbf16> to vector<2x8x16xbf16>
    %251 = vector.extract_strided_slice %216 {offsets = [0, 0, 32], sizes = [2, 8, 16], strides = [1, 1, 1]} : vector<2x8x64xbf16> to vector<2x8x16xbf16>
    "tpu.trace_start"() <{level = 10 : i32, message = "bqd,bkd->bqk"}> : () -> ()
    %cst_118 = arith.constant dense<0.000000e+00> : vector<2x8x8xf32>
    %252 = tpu.matmul %250, %251, %cst_118 {dimension_numbers = #tpu.dot_dimension_numbers<[2], [2], [1], [1], [0, 0, 0, 1, 1, 1], [0], [0]>} : vector<2x8x16xbf16>, vector<2x8x16xbf16>, vector<2x8x8xf32> -> vector<2x8x8xf32>
    "tpu.trace_stop"() : () -> ()
    %cst_119 = arith.constant dense<0xFF800000> : vector<2x8xf32>
    %253 = vector.multi_reduction <maximumf>, %252, %cst_119 [2] : vector<2x8x8xf32> to vector<2x8xf32>
    %254 = vector.shape_cast %253 : vector<2x8xf32> to vector<2x8x1xf32>
    %255 = vector.broadcast %254 : vector<2x8x1xf32> to vector<2x8x8xf32>
    %256 = arith.subf %252, %255 : vector<2x8x8xf32>
    %257 = math.exp %256 : vector<2x8x8xf32>
    %cst_120 = arith.constant dense<0.000000e+00> : vector<2x8xf32>
    %258 = vector.multi_reduction <add>, %257, %cst_120 [2] : vector<2x8x8xf32> to vector<2x8xf32>
    %259 = vector.shape_cast %258 : vector<2x8xf32> to vector<2x8x1xf32>
    %260 = vector.broadcast %259 : vector<2x8x1xf32> to vector<2x8x8xf32>
    %261 = arith.divf %257, %260 : vector<2x8x8xf32>
    %262 = arith.truncf %261 : vector<2x8x8xf32> to vector<2x8x8xbf16>
    %263 = vector.extract_strided_slice %219 {offsets = [0, 0, 32], sizes = [2, 8, 16], strides = [1, 1, 1]} : vector<2x8x64xbf16> to vector<2x8x16xbf16>
    "tpu.trace_start"() <{level = 10 : i32, message = "bqk,bkd->bqd"}> : () -> ()
    %cst_121 = arith.constant dense<0.000000e+00> : vector<2x8x16xf32>
    %264 = tpu.matmul %262, %263, %cst_121 {dimension_numbers = #tpu.dot_dimension_numbers<[2], [1], [1], [2], [0, 0, 0, 1, 1, 2], [0], [0]>} : vector<2x8x8xbf16>, vector<2x8x16xbf16>, vector<2x8x16xf32> -> vector<2x8x16xf32>
    "tpu.trace_stop"() : () -> ()
    %265 = vector.extract_strided_slice %213 {offsets = [0, 0, 48], sizes = [2, 8, 16], strides = [1, 1, 1]} : vector<2x8x64xbf16> to vector<2x8x16xbf16>
    %266 = vector.extract_strided_slice %216 {offsets = [0, 0, 48], sizes = [2, 8, 16], strides = [1, 1, 1]} : vector<2x8x64xbf16> to vector<2x8x16xbf16>
    "tpu.trace_start"() <{level = 10 : i32, message = "bqd,bkd->bqk"}> : () -> ()
    %cst_122 = arith.constant dense<0.000000e+00> : vector<2x8x8xf32>
    %267 = tpu.matmul %265, %266, %cst_122 {dimension_numbers = #tpu.dot_dimension_numbers<[2], [2], [1], [1], [0, 0, 0, 1, 1, 1], [0], [0]>} : vector<2x8x16xbf16>, vector<2x8x16xbf16>, vector<2x8x8xf32> -> vector<2x8x8xf32>
    "tpu.trace_stop"() : () -> ()
    %cst_123 = arith.constant dense<0xFF800000> : vector<2x8xf32>
    %268 = vector.multi_reduction <maximumf>, %267, %cst_123 [2] : vector<2x8x8xf32> to vector<2x8xf32>
    %269 = vector.shape_cast %268 : vector<2x8xf32> to vector<2x8x1xf32>
    %270 = vector.broadcast %269 : vector<2x8x1xf32> to vector<2x8x8xf32>
    %271 = arith.subf %267, %270 : vector<2x8x8xf32>
    %272 = math.exp %271 : vector<2x8x8xf32>
    %cst_124 = arith.constant dense<0.000000e+00> : vector<2x8xf32>
    %273 = vector.multi_reduction <add>, %272, %cst_124 [2] : vector<2x8x8xf32> to vector<2x8xf32>
    %274 = vector.shape_cast %273 : vector<2x8xf32> to vector<2x8x1xf32>
    %275 = vector.broadcast %274 : vector<2x8x1xf32> to vector<2x8x8xf32>
    %276 = arith.divf %272, %275 : vector<2x8x8xf32>
    %277 = arith.truncf %276 : vector<2x8x8xf32> to vector<2x8x8xbf16>
    %278 = vector.extract_strided_slice %219 {offsets = [0, 0, 48], sizes = [2, 8, 16], strides = [1, 1, 1]} : vector<2x8x64xbf16> to vector<2x8x16xbf16>
    "tpu.trace_start"() <{level = 10 : i32, message = "bqk,bkd->bqd"}> : () -> ()
    %cst_125 = arith.constant dense<0.000000e+00> : vector<2x8x16xf32>
    %279 = tpu.matmul %277, %278, %cst_125 {dimension_numbers = #tpu.dot_dimension_numbers<[2], [1], [1], [2], [0, 0, 0, 1, 1, 2], [0], [0]>} : vector<2x8x8xbf16>, vector<2x8x16xbf16>, vector<2x8x16xf32> -> vector<2x8x16xf32>
    "tpu.trace_stop"() : () -> ()
    %280 = tpu.concatenate %234, %249, %264, %279 in 2 : vector<2x8x16xf32>, vector<2x8x16xf32>, vector<2x8x16xf32>, vector<2x8x16xf32> -> vector<2x8x64xf32>
    %281 = vector.shape_cast %280 : vector<2x8x64xf32> to vector<16x64xf32>
    %282 = arith.truncf %281 : vector<16x64xf32> to vector<16x64xbf16>
    %cst_126 = arith.constant dense<0.000000e+00> : vector<16x64xf32>
    %283 = tpu.matmul %282, %172, %cst_126 {dimension_numbers = #tpu.dot_dimension_numbers<[1], [0], [0], [1], [0, 0, 1, 1], [], []>} : vector<16x64xbf16>, vector<64x64xbf16>, vector<16x64xf32> -> vector<16x64xf32>
    %284 = arith.addf %162, %283 : vector<16x64xf32>
    %285 = vector.broadcast %174 : vector<1x64xf32> to vector<16x64xf32>
    %286 = arith.addf %284, %285 : vector<16x64xf32>
    %cst_127 = arith.constant dense<0.000000e+00> : vector<16xf32>
    %287 = vector.multi_reduction <add>, %286, %cst_127 [1] : vector<16x64xf32> to vector<16xf32>
    %288 = vector.shape_cast %287 : vector<16xf32> to vector<16x1xf32>
    %cst_128 = arith.constant 6.400000e+01 : f32
    %289 = vector.broadcast %cst_128 : f32 to vector<16x1xf32>
    %290 = arith.divf %288, %289 : vector<16x1xf32>
    %291 = vector.broadcast %290 : vector<16x1xf32> to vector<16x64xf32>
    %292 = arith.subf %286, %291 : vector<16x64xf32>
    %293 = arith.mulf %292, %292 : vector<16x64xf32>
    %cst_129 = arith.constant dense<0.000000e+00> : vector<16xf32>
    %294 = vector.multi_reduction <add>, %293, %cst_129 [1] : vector<16x64xf32> to vector<16xf32>
    %295 = vector.shape_cast %294 : vector<16xf32> to vector<16x1xf32>
    %cst_130 = arith.constant 6.400000e+01 : f32
    %296 = vector.broadcast %cst_130 : f32 to vector<16x1xf32>
    %297 = arith.divf %295, %296 : vector<16x1xf32>
    %cst_131 = arith.constant 9.99999974E-6 : f32
    %298 = vector.broadcast %cst_131 : f32 to vector<16x1xf32>
    %299 = arith.addf %297, %298 : vector<16x1xf32>
    %300 = math.rsqrt %299 : vector<16x1xf32>
    %301 = vector.broadcast %300 : vector<16x1xf32> to vector<16x64xf32>
    %302 = arith.mulf %292, %301 : vector<16x64xf32>
    %303 = vector.broadcast %176 : vector<1x64xf32> to vector<16x64xf32>
    %304 = arith.mulf %302, %303 : vector<16x64xf32>
    %305 = vector.broadcast %178 : vector<1x64xf32> to vector<16x64xf32>
    %306 = arith.addf %304, %305 : vector<16x64xf32>
    %307 = arith.truncf %306 : vector<16x64xf32> to vector<16x64xbf16>
    %cst_132 = arith.constant dense<0.000000e+00> : vector<16x256xf32>
    %308 = tpu.matmul %307, %180, %cst_132 {dimension_numbers = #tpu.dot_dimension_numbers<[1], [0], [0], [1], [0, 0, 1, 1], [], []>} : vector<16x64xbf16>, vector<64x256xbf16>, vector<16x256xf32> -> vector<16x256xf32>
    %309 = vector.broadcast %182 : vector<1x256xf32> to vector<16x256xf32>
    %310 = arith.addf %308, %309 : vector<16x256xf32>
    %cst_133 = arith.constant 1.702000e+00 : f32
    %311 = vector.broadcast %cst_133 : f32 to vector<16x256xf32>
    %312 = arith.mulf %311, %310 : vector<16x256xf32>
    %313 = arith.negf %312 : vector<16x256xf32>
    %314 = math.exp %313 : vector<16x256xf32>
    %cst_134 = arith.constant 1.000000e+00 : f32
    %315 = vector.broadcast %cst_134 : f32 to vector<16x256xf32>
    %316 = arith.addf %315, %314 : vector<16x256xf32>
    %317 = arith.divf %315, %316 : vector<16x256xf32>
    %318 = arith.mulf %310, %317 : vector<16x256xf32>
    %319 = arith.truncf %318 : vector<16x256xf32> to vector<16x256xbf16>
    %cst_135 = arith.constant dense<0.000000e+00> : vector<16x64xf32>
    %320 = tpu.matmul %319, %184, %cst_135 {dimension_numbers = #tpu.dot_dimension_numbers<[1], [0], [0], [1], [0, 0, 1, 1], [], []>} : vector<16x256xbf16>, vector<256x64xbf16>, vector<16x64xf32> -> vector<16x64xf32>
    %321 = arith.addf %286, %320 : vector<16x64xf32>
    %322 = vector.broadcast %186 : vector<1x64xf32> to vector<16x64xf32>
    %323 = arith.addf %321, %322 : vector<16x64xf32>
    %324 = vector.shape_cast %323 : vector<16x64xf32> to vector<2x8x64xf32>
    %325 = vector.extract_strided_slice %324 {offsets = [0, 0, 0], sizes = [2, 1, 64], strides = [1, 1, 1]} : vector<2x8x64xf32> to vector<2x1x64xf32>
    %c0_136 = arith.constant 0 : index
    %c0_137 = arith.constant 0 : index
    %c0_138 = arith.constant 0 : index
    %326 = vector.load %arg14[%c0_136, %c0_137, %c0_138] : memref<2x1x64xf32, #tpu.memory_space<vmem>>, vector<2x1x64xf32>
    tpu.vector_store %arg14[%c0_136, %c0_137, %c0_138], %325 {strides = array<i32>} : memref<2x1x64xf32, #tpu.memory_space<vmem>>, vector<2x1x64xf32>,
    return
  }
  func.func @transform_0(%arg0: i32) -> (i32, i32, i32) {
    %c0_i32 = arith.constant 0 : i32
    %c0_i32_0 = arith.constant 0 : i32
    %c0_i32_1 = arith.constant 0 : i32
    return %arg0, %c0_i32, %c0_i32_0 : i32, i32, i32
  }
  func.func @transform_1(%arg0: i32) -> (i32, i32, i32) {
    %c0_i32 = arith.constant 0 : i32
    %c0_i32_0 = arith.constant 0 : i32
    %c0_i32_1 = arith.constant 0 : i32
    %c0_i32_2 = arith.constant 0 : i32
    return %c0_i32, %c0_i32_0, %c0_i32_1 : i32, i32, i32
  }
  func.func @transform_2(%arg0: i32) -> (i32, i32, i32) {
    %c0_i32 = arith.constant 0 : i32
    %c0_i32_0 = arith.constant 0 : i32
    %c0_i32_1 = arith.constant 0 : i32
    %c0_i32_2 = arith.constant 0 : i32
    return %c0_i32, %c0_i32_0, %c0_i32_1 : i32, i32, i32
  }
  func.func @transform_3(%arg0: i32) -> (i32, i32, i32) {
    %c0_i32 = arith.constant 0 : i32
    %c0_i32_0 = arith.constant 0 : i32
    %c0_i32_1 = arith.constant 0 : i32
    %c0_i32_2 = arith.constant 0 : i32
    return %c0_i32, %c0_i32_0, %c0_i32_1 : i32, i32, i32
  }
  func.func @transform_4(%arg0: i32) -> (i32, i32, i32) {
    %c0_i32 = arith.constant 0 : i32
    %c0_i32_0 = arith.constant 0 : i32
    %c0_i32_1 = arith.constant 0 : i32
    %c0_i32_2 = arith.constant 0 : i32
    return %c0_i32, %c0_i32_0, %c0_i32_1 : i32, i32, i32
  }
  func.func @transform_5(%arg0: i32) -> (i32, i32, i32) {
    %c0_i32 = arith.constant 0 : i32
    %c0_i32_0 = arith.constant 0 : i32
    %c0_i32_1 = arith.constant 0 : i32
    %c0_i32_2 = arith.constant 0 : i32
    return %c0_i32, %c0_i32_0, %c0_i32_1 : i32, i32, i32
  }
  func.func @transform_6(%arg0: i32) -> (i32, i32, i32) {
    %c0_i32 = arith.constant 0 : i32
    %c0_i32_0 = arith.constant 0 : i32
    %c0_i32_1 = arith.constant 0 : i32
    %c0_i32_2 = arith.constant 0 : i32
    return %c0_i32, %c0_i32_0, %c0_i32_1 : i32, i32, i32
  }
  func.func @transform_7(%arg0: i32) -> (i32, i32, i32) {
    %c0_i32 = arith.constant 0 : i32
    %c0_i32_0 = arith.constant 0 : i32
    %c0_i32_1 = arith.constant 0 : i32
    %c0_i32_2 = arith.constant 0 : i32
    return %c0_i32, %c0_i32_0, %c0_i32_1 : i32, i32, i32
  }
  func.func @transform_8(%arg0: i32) -> (i32, i32, i32) {
    %c0_i32 = arith.constant 0 : i32
    %c0_i32_0 = arith.constant 0 : i32
    %c0_i32_1 = arith.constant 0 : i32
    %c0_i32_2 = arith.constant 0 : i32
    return %c0_i32, %c0_i32_0, %c0_i32_1 : i32, i32, i32
  }
  func.func @transform_9(%arg0: i32) -> (i32, i32, i32) {
    %c0_i32 = arith.constant 0 : i32
    %c0_i32_0 = arith.constant 0 : i32
    %c0_i32_1 = arith.constant 0 : i32
    %c0_i32_2 = arith.constant 0 : i32
    return %c0_i32, %c0_i32_0, %c0_i32_1 : i32, i32, i32
  }
  func.func @transform_10(%arg0: i32) -> (i32, i32, i32) {
    %c0_i32 = arith.constant 0 : i32
    %c0_i32_0 = arith.constant 0 : i32
    %c0_i32_1 = arith.constant 0 : i32
    %c0_i32_2 = arith.constant 0 : i32
    return %c0_i32, %c0_i32_0, %c0_i32_1 : i32, i32, i32
  }
  func.func @transform_11(%arg0: i32) -> (i32, i32, i32) {
    %c0_i32 = arith.constant 0 : i32
    %c0_i32_0 = arith.constant 0 : i32
    %c0_i32_1 = arith.constant 0 : i32
    %c0_i32_2 = arith.constant 0 : i32
    return %c0_i32, %c0_i32_0, %c0_i32_1 : i32, i32, i32
  }
  func.func @transform_12(%arg0: i32) -> (i32, i32, i32) {
    %c0_i32 = arith.constant 0 : i32
    %c0_i32_0 = arith.constant 0 : i32
    %c0_i32_1 = arith.constant 0 : i32
    %c0_i32_2 = arith.constant 0 : i32
    return %c0_i32, %c0_i32_0, %c0_i32_1 : i32, i32, i32
  }
  func.func @transform_13(%arg0: i32) -> (i32, i32, i32) {
    %c0_i32 = arith.constant 0 : i32
    %c0_i32_0 = arith.constant 0 : i32
    %c0_i32_1 = arith.constant 0 : i32
    return %arg0, %c0_i32, %c0_i32_0 : i32, i32, i32
  }
}

</mosaic_0001>

<bundles_post_ra>
// kernel: clipnet_ft_forward.1
= control target key start
LH: loop header
LB: loop body
LE: loop exit
PB: predicated region body
PF: predicated region fallthrough
CT: control target
= control target key end

     0   :  { %vm111_vm0 = vcmask 523264   ;;  %v3869_v22 = vmov 0   ;;  %v3870_v40 = vmov 0.0   ;;  %v157_v41 = vlaneseq  ;;  %s3872_s15 = smov 64   ;;  %s3873_s16 = smov 48   ;;  %s4659_s0 = inlined_call_operand.vmem [shape: f32[2,8,64], index: 0, kind: input, shape index: {}]   ;;  %s4660_s3 = inlined_call_operand.vmem [shape: bf16[2,64,192], index: 3, kind: input, shape index: {}]   ;;  %s4661_s1 = inlined_call_operand.vmem [shape: f32[2,1,64], index: 1, kind: input, shape index: {}]   ;;  %s4662_s2 = inlined_call_operand.vmem [shape: f32[2,1,64], index: 2, kind: input, shape index: {}]   ;;  %s4663_s4 = inlined_call_operand.vmem [shape: f32[2,1,192], index: 4, kind: input, shape index: {}]   ;;  %s4664_s5 = inlined_call_operand.vmem [shape: bf16[2,64,64], index: 5, kind: input, shape index: {}]   ;;  %s4665_s6 = inlined_call_operand.vmem [shape: f32[2,1,64], index: 6, kind: input, shape index: {}]   ;;  %s4666_s9 = inlined_call_operand.vmem [shape: bf16[2,64,256], index: 9, kind: input, shape index: {}]   ;;  %s4667_s7 = inlined_call_operand.vmem [shape: f32[2,1,64], index: 7, kind: input, shape index: {}]   ;;  %s4668_s8 = inlined_call_operand.vmem [shape: f32[2,1,64], index: 8, kind: input, shape index: {}]   ;;  %s4669_s11 = inlined_call_operand.vmem [shape: bf16[2,256,64], index: 11, kind: input, shape index: {}]   ;;  %s4670_s10 = inlined_call_operand.vmem [shape: f32[2,1,256], index: 10, kind: input, shape index: {}]   ;;  %s4671_s12 = inlined_call_operand.vmem [shape: f32[2,1,64], index: 12, kind: input, shape index: {}]   ;;  %s4672_s13 = inlined_call_operand.vmem [shape: f32[2,1,64], index: 13, kind: output, shape index: {}]  }
   0x1   :  { %v3952_v0 = vld [vmem:[%s4659_s0] sm:$0xff]  ;;  %v3957_v1 = vld [vmem:[%s4659_s0 + $0x8] sm:$0xff]  ;;  %v3672_v16 = vld [vmem:[%s4660_s3 + $0x14] ss:$8 sps:$4 sm:$0xff]   ;;  %242 = vmatprep.mubr.bf16.mxu1 %v3869_v22  ;;  %3425 = vmatprep.subr.bf16.mxu0 %v3870_v40  ;;  %vm3871_vm1 = vmmov 0   ;;  %vm384_vm2 = vcmask 1043456  }
   0x2   :  { %v112_v2 = vsel %vm111_vm0, %v3952_v0, 0.0  ;;  %v115_v3 = vsel %vm111_vm0, %v3957_v1, 0.0  ;;  %v3669_v14 = vld [vmem:[%s4660_s3 + $0x4] ss:$8 sps:$4 sm:$0xff]   ;;  %v3671_v15 = vld [vmem:[%s4660_s3] ss:$8 sps:$4 sm:$0xff]   ;;  %3427 = vmatprep.mubr.msk.bf16.mxu0 %vm3871_vm1, %v3870_v40 }
   0x3   :  { %113 = vadd.xlane.f32.xlu0 %v112_v2  ;;  %210 = vmatprep.subr.bf16.mxu1 %v3669_v14  ;;  %v3674_v17 = vld [vmem:[%s4660_s3 + $0x10] ss:$8 sps:$4 sm:$0xff]   ;;  %v3675_v18 = vld [vmem:[%s4660_s3 + $0x24] ss:$8 sps:$4 sm:$0xff]   ;;  %v3677_v19 = vld [vmem:[%s4660_s3 + $0x20] ss:$8 sps:$4 sm:$0xff]  }
   0x4   :  { %211 = vmatpush1.bf16.msra.mxu1 %v3671_v15  ;;  %v3678_v20 = vld [vmem:[%s4660_s3 + $0x34] ss:$8 sps:$4 sm:$0xff]   ;;  %v3680_v21 = vld [vmem:[%s4660_s3 + $0x30] ss:$8 sps:$4 sm:$0xff]   ;;  %v3101_v31 = vld [vmem:[%s4661_s1] ss:$0 sm:$0xff] }
   0x5   :  { %212 = vmatprep.subr.bf16.mxu1 %v3672_v16  ;;  %v3102_v35 = vld [vmem:[%s4662_s2] ss:$0 sm:$0xff]  ;;  %v158_v42 = vshrl.u32 %v157_v41, 7  ;;  %vm260_vm3 = vcmask 130048   ;;  %vm356_vm4 = vcmask 64512   ;;  %s3874_s17 = smov 112  }
   0x6   :  { %v57_v44 = vld [vmem:[%s4663_s4] sm:$0x3]  ;;  %s3875_s18 = smov 32   ;;  %s3876_s19 = smov 96   ;;  %vm1162_vm5 = vcmask 261120   ;;  %vm1165_vm6 = vcmask 392192  }
   0x7   :  { %116 = vadd.xlane.f32.xlu0 %v115_v3  ;;  %v4001_v43 = vsub.s32 0, %v158_v42  ;;  %v4006_v45 = vsub.s32 1, %v158_v42  ;;  %s3877_s20 = smov 16   ;;  %s3878_s21 = smov 80   ;;  %vm3094_vm7 = vcmask 516096  }
   0x8   :  { %213 = vmatpush1.bf16.msra.mxu1 %v3674_v17 }
   0x9   :  { %214 = vmatprep.subr.bf16.mxu1 %v3675_v18  ;;  %v160_v46 = vrot.slane %v57_v44, %v4001_v43  ;;  %v164_v47 = vrot.slane %v57_v44, %v4006_v45 }
   0xc   :  { %215 = vmatpush1.bf16.msra.mxu1 %v3677_v19 }
   0xd   :  { %216 = vmatprep.subr.bf16.mxu1 %v3678_v20 }
  0x10   :  { %217 = vmatpush1.bf16.msra.mxu1 %v3680_v21 }
  0x11   :  { %3413 = vmatprep.subr.bf16.mxu1 %v3870_v40 }
  0x90   :  { %v114_v4 = vpop.xlane.xlu0 %113 }
  0x91   :  { %v119_v5 = vmul.f32 0.015625, %v114_v4 }
  0x93   :  { %v121_v6 = vsub.f32 %v3952_v0, %v119_v5 }
  0x94   :  { %v117_v7 = vpop.xlane.xlu0 %116 }
  0x95   :  { %v120_v8 = vmul.f32 0.015625, %v117_v7  ;;  %v123_v9 = vmul.f32 %v121_v6, %v121_v6 }
  0x97   :  { %v122_v10 = vsub.f32 %v3957_v1, %v120_v8  ;;  %v125_v11 = vsel %vm111_vm0, %v123_v9, 0.0 }
  0x98   :  { %126 = vadd.xlane.f32.xlu1 %v125_v11 }
  0x99   :  { %v124_v12 = vmul.f32 %v122_v10, %v122_v10 }
  0x9b   :  { %v128_v13 = vsel %vm111_vm0, %v124_v12, 0.0 }
  0x9c   :  { %129 = vadd.xlane.f32.xlu1 %v128_v13 }
 0x125   :  { %v127_v23 = vpop.xlane.xlu1 %126 }
 0x126   :  { %v131_v24 = vmul.f32 0.015625, %v127_v23 }
 0x128   :  { %v133_v25 = vadd.f32 1e-05, %v131_v24 }
 0x129   :  { %v130_v26 = vpop.xlane.xlu1 %129 }
 0x12a   :  { %3757 = vrsqrt.f32 %v133_v25  ;;  %v132_v27 = vmul.f32 0.015625, %v130_v26 }
 0x12c   :  { %v134_v28 = vadd.f32 1e-05, %v132_v27 }
 0x12e   :  { %3759 = vrsqrt.f32 %v134_v28 }
 0x134   :  { %v3758_v29 = vpop.eup %3757 }
 0x135   :  { %v137_v30 = vmul.f32 %v3758_v29, %v121_v6 }
 0x137   :  { %v145_v34 = vmul.f32 %v3101_v31, %v137_v30 }
 0x138   :  { %v3760_v32 = vpop.eup %3759 }
 0x139   :  { %v138_v33 = vmul.f32 %v3760_v32, %v122_v10  ;;  %v153_v37 = vadd.f32 %v3102_v35, %v145_v34 }
 0x13b   :  { %v146_v36 = vmul.f32 %v3101_v31, %v138_v33 }
 0x13d   :  { %v154_v38 = vadd.f32 %v3102_v35, %v146_v36 }
 0x13f   :  { %v155_v39 = vpack.c.bf16 %v154_v38, %v153_v37 }
 0x141   :  { %3111 = vmatmul.mubr.msk.bf16.vlgmr.msra.gmra.mrb[0].mxu1 %vm111_vm0, %v155_v39 }
 0x142   :  { %3415 = vmatprep.mubr.msk.bf16.mxu1 %vm3871_vm1, %v3870_v40 }
 0x214   :  { %v244_v48 = vpop.f32.mrb[0].mxu1 }
 0x215   :  { %v245_v49 = vadd.f32 %v244_v48, %v160_v46  ;;  %v246_v50 = vpop.f32.mrb[1].mxu1 }
 0x216   :  { %v247_v51 = vadd.f32 %v246_v50, %v164_v47  ;;  %v248_v52 = vpop.f32.mrb[2].mxu1 }
 0x217   :  { %v4014_v53 = vpack.c.bf16 %v245_v49, %v245_v49  ;;  %v249_v54 = vadd.f32 %v248_v52, %v160_v46  ;;  %v250_v55 = vpop.f32.mrb[3].mxu1 }
 0x218   :  { %v4016_v56 = vpack.c.bf16 %v247_v51, %v247_v51  ;;  %v251_v57 = vadd.f32 %v250_v55, %v164_v47 }
 0x219   :  { %v4018_v58 = vpack.c.bf16 %v249_v54, %v249_v54  ;;  %258 = vrot.lane.b32.xlu0 %v4014_v53, %s3872_s15 }
 0x21a   :  { %v386_v59 = vsel %vm384_vm2, %v4016_v56, 0  ;;  %v4035_v2 = vpack.c.bf16 %v251_v57, %v251_v57 }
 0x21b   :  { %308 = vrot.lane.b32.xlu1 %v4018_v58, %s3872_s15  ;;  %3426 = vmatpush3.bf16.msra.mxu0 %v386_v59 }
 0x21c   :  { %3437 = vmatprep.subr.bf16.mxu0 %v3870_v40  ;;  %v432_v3 = vsel %vm384_vm2, %v4035_v2, 0 }
 0x28b   :  { %v259_v60 = vpop.permute.xlu0 %258 }
 0x28c   :  { %v265_v61 = vsel %vm260_vm3, %v259_v60, 0 }
 0x28d   :  { %3414 = vmatpush3.bf16.xpose.msra.mxu1 %v265_v61  ;;  %v309_v62 = vpop.permute.xlu1 %308 }
 0x28e   :  { %3419 = vmatprep.subr.bf16.mxu1 %v3870_v40  ;;  %v314_v63 = vsel %vm260_vm3, %v309_v62, 0 }
 0x294   :  { %3416 = vmatmul.mubr.msk.bf16.vlgmr.msra.gmra.mrb[4].mxu1 %vm260_vm3, %v4014_v53 }
 0x295   :  { %3420 = vmatpush3.bf16.xpose.msra.mxu1 %v314_v63  ;;  %3421 = vmatprep.mubr.msk.bf16.mxu1 %vm3871_vm1, %v3870_v40 }
 0x296   :  { %3431 = vmatprep.subr.bf16.mxu1 %v3870_v40 }
 0x29c   :  { %3422 = vmatmul.mubr.msk.bf16.vlgmr.msra.gmra.mrb[8].mxu1 %vm260_vm3, %v4018_v58 }
 0x29d   :  { %3432 = vmatpush3.bf16.msra.mxu1 %v432_v3  ;;  %3433 = vmatprep.mubr.msk.bf16.mxu1 %vm3871_vm1, %v3870_v40 }
 0x29e   :  { %3443 = vmatprep.subr.bf16.mxu1 %v3870_v40 }
 0x367   :  { %v301_v4 = vpop.f32.mrb[4].mxu1 }
 0x368   :  { %v3417_v5 = vpop.f32.mrb[5].mxu1  ;;  %v357_v6 = vsel %vm356_vm4, %v301_v4, -inf }
 0x369   :  { %358 = vmax.xlane.f32.xlu1 %v357_v6  ;;  %v304_v7 = vpop.f32.mrb[6].mxu1 }
 0x36a   :  { %v3418_v8 = vpop.f32.mrb[7].mxu1 }
 0x36f   :  { %v350_v9 = vpop.f32.mrb[8].mxu1 }
 0x370   :  { %v3423_v10 = vpop.f32.mrb[9].mxu1  ;;  %v360_v11 = vsel %vm356_vm4, %v350_v9, -inf }
 0x371   :  { %361 = vmax.xlane.f32.xlu0 %v360_v11  ;;  %v353_v12 = vpop.f32.mrb[10].mxu1 }
 0x372   :  { %v3424_v13 = vpop.f32.mrb[11].mxu1 }
 0x37a   :  { %526 = vrot.lane.b32.xlu1 %v4018_v58, %s3873_s16 }
 0x3f6   :  { %v359_v14 = vpop.xlane.xlu1 %358 }
 0x3f7   :  { %v363_v15 = vsub.f32 %v301_v4, %v359_v14 }
 0x3f9   :  { %v365_v16 = vmul.f32 1.442695, %v363_v15 }
 0x3fa   :  { %v527_v26 = vpop.permute.xlu1 %526 }
 0x3fb   :  { %3761 = vpow2.f32 %v365_v16  ;;  %v532_v37 = vsel %vm260_vm3, %v527_v26, 0 }
 0x3fe   :  { %v362_v17 = vpop.xlane.xlu0 %361 }
 0x3ff   :  { %v364_v18 = vsub.f32 %v350_v9, %v362_v17 }
 0x401   :  { %v367_v19 = vmul.f32 1.442695, %v364_v18 }
 0x403   :  { %3763 = vpow2.f32 %v367_v19 }
 0x405   :  { %v3762_v20 = vpop.eup %3761 }
 0x406   :  { %v369_v21 = vsel %vm356_vm4, %v3762_v20, 0.0 }
 0x407   :  { %370 = vadd.xlane.f32.xlu0 %v369_v21 }
 0x40d   :  { %v3764_v23 = vpop.eup %3763 }
 0x40e   :  { %v372_v24 = vsel %vm356_vm4, %v3764_v23, 0.0 }
 0x40f   :  { %373 = vadd.xlane.f32.xlu1 %v372_v24 }
 0x41d   :  { %476 = vrot.lane.b32.xlu0 %v4014_v53, %s3873_s16 }
 0x420   :  { %474 = vrot.lane.b32.xlu1 %v4014_v53, %s3874_s17 }
 0x424   :  { %524 = vrot.lane.b32.xlu1 %v4018_v58, %s3874_s17 }
 0x494   :  { %v371_v25 = vpop.xlane.xlu0 %370 }
 0x495   :  { %3765 = vrcp.f32 %v371_v25 }
 0x498   :  { %v477_v30 = vpop.permute.xlu0 %476 }
 0x499   :  { %v482_v32 = vsel %vm260_vm3, %v477_v30, 0 }
 0x49c   :  { %v374_v27 = vpop.xlane.xlu1 %373 }
 0x49d   :  { %3767 = vrcp.f32 %v374_v27 }
 0x49f   :  { %v3766_v28 = vpop.eup %3765 }
 0x4a0   :  { %v376_v29 = vmul.f32 %v3766_v28, %v3762_v20  ;;  %v475_v36 = vpop.permute.xlu1 %474 }
 0x4a2   :  { %v379_v31 = vpack.c.bf16 %v376_v29, %v376_v29 }
 0x4a4   :  { %3428 = vmatmul.mubr.msk.bf16.vlgmr.msra.gmra.mrb[0].mxu0 %vm356_vm4, %v379_v31  ;;  %v525_v38 = vpop.permute.xlu1 %524 }
 0x4a5   :  { %3438 = vmatpush3.bf16.xpose.msra.mxu0 %v482_v32  ;;  %3439 = vmatprep.mubr.msk.bf16.mxu0 %vm3871_vm1, %v3870_v40 }
 0x4a6   :  { %3449 = vmatprep.subr.bf16.mxu0 %v3870_v40 }
 0x4a7   :  { %v3768_v33 = vpop.eup %3767 }
 0x4a8   :  { %v378_v34 = vmul.f32 %v3768_v33, %v3764_v23 }
 0x4aa   :  { %v380_v35 = vpack.c.bf16 %v378_v34, %v378_v34 }
 0x4ac   :  { %3434 = vmatmul.mubr.msk.bf16.vlgmr.msra.gmra.mrb[12].mxu1 %vm356_vm4, %v380_v35  ;;  %3440 = vmatmul.mubr.msk.bf16.vlgmr.msra.gmra.mrb[4].mxu0 %vm260_vm3, %v475_v36 }
 0x4ad   :  { %3444 = vmatpush3.bf16.xpose.msra.mxu1 %v532_v37  ;;  %3445 = vmatprep.mubr.msk.bf16.mxu1 %vm3871_vm1, %v3870_v40 }
 0x4ae   :  { %3455 = vmatprep.subr.bf16.mxu1 %v3870_v40  ;;  %3451 = vmatprep.mubr.msk.bf16.mxu0 %vm3871_vm1, %v3870_v40 }
 0x4b4   :  { %3446 = vmatmul.mubr.msk.bf16.vlgmr.msra.gmra.mrb[16].mxu1 %vm260_vm3, %v525_v38 }
 0x4b5   :  { %3457 = vmatprep.mubr.msk.bf16.mxu1 %vm3871_vm1, %v3870_v40 }
 0x577   :  { %v4072_v39 = vpop.f32.mrb[0].mxu0 }
 0x578   :  { %v3429_v41 = vpop.f32.mrb[1].mxu0 }
 0x579   :  { %v425_v42 = vpop.f32.mrb[2].mxu0 }
 0x57a   :  { %v3430_v44 = vpop.f32.mrb[3].mxu0 }
 0x57f   :  { %v4074_v46 = vpop.f32.mrb[12].mxu1  ;;  %v518_v47 = vpop.f32.mrb[4].mxu0 }
 0x580   :  { %v3435_v48 = vpop.f32.mrb[13].mxu1  ;;  %v3441_v49 = vpop.f32.mrb[5].mxu0  ;;  %v574_v50 = vsel %vm356_vm4, %v518_v47, -inf }
 0x581   :  { %575 = vmax.xlane.f32.xlu0 %v574_v50  ;;  %v471_v51 = vpop.f32.mrb[14].mxu1  ;;  %v521_v52 = vpop.f32.mrb[6].mxu0 }
 0x582   :  { %v3436_v54 = vpop.f32.mrb[15].mxu1  ;;  %v3442_v55 = vpop.f32.mrb[7].mxu0 }
 0x587   :  { %v568_v57 = vpop.f32.mrb[16].mxu1 }
 0x588   :  { %v3447_v59 = vpop.f32.mrb[17].mxu1  ;;  %v577_v60 = vsel %vm356_vm4, %v568_v57, -inf }
 0x589   :  { %578 = vmax.xlane.f32.xlu1 %v577_v60  ;;  %v571_v61 = vpop.f32.mrb[18].mxu1 }
 0x58a   :  { %v3448_v62 = vpop.f32.mrb[19].mxu1 }
 0x59a   :  { %648 = vrot.lane.b32.xlu1 %v4035_v2, %s3874_s17 }
 0x59e   :  { %698 = vrot.lane.b32.xlu1 %v4014_v53, %s3875_s18 }
 0x5a2   :  { %748 = vrot.lane.b32.xlu1 %v4018_v58, %s3875_s18 }
 0x5a6   :  { %746 = vrot.lane.b32.xlu1 %v4018_v58, %s3876_s19 }
 0x60e   :  { %v576_v63 = vpop.xlane.xlu0 %575 }
 0x60f   :  { %v580_v3 = vsub.f32 %v518_v47, %v576_v63 }
 0x611   :  { %v582_v4 = vmul.f32 1.442695, %v580_v3 }
 0x613   :  { %3769 = vpow2.f32 %v582_v4 }
 0x616   :  { %v579_v5 = vpop.xlane.xlu1 %578 }
 0x617   :  { %v581_v6 = vsub.f32 %v568_v57, %v579_v5 }
 0x619   :  { %v584_v7 = vmul.f32 1.442695, %v581_v6 }
 0x61a   :  { %v649_v8 = vpop.permute.xlu1 %648 }
 0x61b   :  { %3771 = vpow2.f32 %v584_v7  ;;  %v654_v9 = vsel %vm384_vm2, %v649_v8, 0 }
 0x61c   :  { %3456 = vmatpush3.bf16.msra.mxu1 %v654_v9 }
 0x61d   :  { %v3770_v10 = vpop.eup %3769  ;;  %3467 = vmatprep.subr.bf16.mxu1 %v3870_v40 }
 0x61e   :  { %v586_v11 = vsel %vm356_vm4, %v3770_v10, 0.0  ;;  %v699_v21 = vpop.permute.xlu1 %698 }
 0x61f   :  { %587 = vadd.xlane.f32.xlu0 %v586_v11  ;;  %v704_v26 = vsel %vm260_vm3, %v699_v21, 0 }
 0x622   :  { %v749_v25 = vpop.permute.xlu1 %748 }
 0x623   :  { %v754_v28 = vsel %vm260_vm3, %v749_v25, 0 }
 0x625   :  { %v3772_v12 = vpop.eup %3771 }
 0x626   :  { %v589_v13 = vsel %vm356_vm4, %v3772_v12, 0.0  ;;  %v747_v30 = vpop.permute.xlu1 %746 }
 0x627   :  { %590 = vadd.xlane.f32.xlu0 %v589_v13 }
 0x63d   :  { %599 = vrot.lane.b32.xlu0 %v4016_v56, %s3874_s17 }
 0x641   :  { %696 = vrot.lane.b32.xlu0 %v4014_v53, %s3876_s19 }
 0x6ac   :  { %v588_v14 = vpop.xlane.xlu0 %587 }
 0x6ad   :  { %3773 = vrcp.f32 %v588_v14 }
 0x6b4   :  { %v591_v15 = vpop.xlane.xlu0 %590 }
 0x6b5   :  { %3775 = vrcp.f32 %v591_v15 }
 0x6b7   :  { %v3774_v16 = vpop.eup %3773 }
 0x6b8   :  { %v593_v17 = vmul.f32 %v3774_v16, %v3770_v10  ;;  %v600_v18 = vpop.permute.xlu0 %599 }
 0x6b9   :  { %v605_v19 = vsel %vm384_vm2, %v600_v18, 0 }
 0x6ba   :  { %3450 = vmatpush3.bf16.msra.mxu0 %v605_v19  ;;  %v596_v20 = vpack.c.bf16 %v593_v17, %v593_v17 }
 0x6bb   :  { %3461 = vmatprep.subr.bf16.mxu0 %v3870_v40 }
 0x6bc   :  { %v697_v29 = vpop.permute.xlu0 %696 }
 0x6bd   :  { %3452 = vmatmul.mubr.msk.bf16.vlgmr.msra.gmra.mrb[8].mxu0 %vm356_vm4, %v596_v20 }
 0x6be   :  { %3463 = vmatprep.mubr.msk.bf16.mxu0 %vm3871_vm1, %v3870_v40 }
 0x6bf   :  { %v3776_v23 = vpop.eup %3775 }
 0x6c0   :  { %v595_v24 = vmul.f32 %v3776_v23, %v3772_v12 }
 0x6c2   :  { %v597_v27 = vpack.c.bf16 %v595_v24, %v595_v24 }
 0x6c3   :  { %3462 = vmatpush3.bf16.xpose.msra.mxu0 %v704_v26 }
 0x6c4   :  { %3458 = vmatmul.mubr.msk.bf16.vlgmr.msra.gmra.mrb[20].mxu1 %vm356_vm4, %v597_v27  ;;  %3473 = vmatprep.subr.bf16.mxu0 %v3870_v40 }
 0x6c5   :  { %3468 = vmatpush3.bf16.xpose.msra.mxu1 %v754_v28  ;;  %3469 = vmatprep.mubr.msk.bf16.mxu1 %vm3871_vm1, %v3870_v40 }
 0x6c6   :  { %3479 = vmatprep.subr.bf16.mxu1 %v3870_v40 }
 0x6ca   :  { %3464 = vmatmul.mubr.msk.bf16.vlgmr.msra.gmra.mrb[12].mxu0 %vm260_vm3, %v697_v29 }
 0x6cb   :  { %3475 = vmatprep.mubr.msk.bf16.mxu0 %vm3871_vm1, %v3870_v40 }
 0x6cc   :  { %3470 = vmatmul.mubr.msk.bf16.vlgmr.msra.gmra.mrb[24].mxu1 %vm260_vm3, %v747_v30 }
 0x6cd   :  { %3481 = vmatprep.mubr.msk.bf16.mxu1 %vm3871_vm1, %v3870_v40 }
 0x790   :  { %v4112_v31 = vpop.f32.mrb[8].mxu0 }
 0x791   :  { %v3453_v32 = vpop.f32.mrb[9].mxu0 }
 0x792   :  { %v644_v33 = vpop.f32.mrb[10].mxu0 }
 0x793   :  { %v3454_v34 = vpop.f32.mrb[11].mxu0 }
 0x797   :  { %v4114_v35 = vpop.f32.mrb[20].mxu1 }
 0x798   :  { %v3639_v36 = vpack.i.bf16 %v4114_v35, %v4112_v31  ;;  %v3459_v37 = vpop.f32.mrb[21].mxu1 }
 0x799   :  { %v693_v38 = vpop.f32.mrb[22].mxu1 }
 0x79a   :  { %v3460_v41 = vpop.f32.mrb[23].mxu1 }
 0x79d   :  { %v740_v42 = vpop.f32.mrb[12].mxu0 }
 0x79e   :  { %v3465_v44 = vpop.f32.mrb[13].mxu0  ;;  %v796_v47 = vsel %vm356_vm4, %v740_v42, -inf }
 0x79f   :  { %797 = vmax.xlane.f32.xlu0 %v796_v47  ;;  %v743_v48 = vpop.f32.mrb[14].mxu0  ;;  %v790_v49 = vpop.f32.mrb[24].mxu1 }
 0x7a0   :  { %v3466_v50 = vpop.f32.mrb[15].mxu0  ;;  %v3471_v51 = vpop.f32.mrb[25].mxu1  ;;  %v799_v52 = vsel %vm356_vm4, %v790_v49, -inf }
 0x7a1   :  { %800 = vmax.xlane.f32.xlu1 %v799_v52  ;;  %v793_v54 = vpop.f32.mrb[26].mxu1 }
 0x7a2   :  { %v3472_v55 = vpop.f32.mrb[27].mxu1 }
 0x7b2   :  { %868 = vrot.lane.b32.xlu1 %v4035_v2, %s3876_s19 }
 0x7b6   :  { %918 = vrot.lane.b32.xlu1 %v4014_v53, %s3877_s20 }
 0x7ba   :  { %968 = vrot.lane.b32.xlu1 %v4018_v58, %s3877_s20 }
 0x7be   :  { %966 = vrot.lane.b32.xlu1 %v4018_v58, %s3878_s21 }
 0x82c   :  { %v798_v57 = vpop.xlane.xlu0 %797 }
 0x82d   :  { %v802_v59 = vsub.f32 %v740_v42, %v798_v57 }
 0x82e   :  { %v801_v60 = vpop.xlane.xlu1 %800 }
 0x82f   :  { %v804_v61 = vmul.f32 1.442695, %v802_v59  ;;  %v803_v62 = vsub.f32 %v790_v49, %v801_v60 }
 0x831   :  { %3777 = vpow2.f32 %v804_v61  ;;  %v806_v63 = vmul.f32 1.442695, %v803_v62 }
 0x832   :  { %v869_v3 = vpop.permute.xlu1 %868 }
 0x833   :  { %3779 = vpow2.f32 %v806_v63  ;;  %v874_v4 = vsel %vm384_vm2, %v869_v3, 0 }
 0x834   :  { %3480 = vmatpush3.bf16.msra.mxu1 %v874_v4 }
 0x835   :  { %3491 = vmatprep.subr.bf16.mxu1 %v3870_v40 }
 0x836   :  { %v919_v13 = vpop.permute.xlu1 %918 }
 0x83a   :  { %v969_v18 = vpop.permute.xlu1 %968 }
 0x83b   :  { %v3778_v5 = vpop.eup %3777  ;;  %v974_v20 = vsel %vm260_vm3, %v969_v18, 0 }
 0x83c   :  { %v808_v6 = vsel %vm356_vm4, %v3778_v5, 0.0 }
 0x83d   :  { %v3780_v7 = vpop.eup %3779  ;;  %809 = vadd.xlane.f32.xlu0 %v808_v6 }
 0x83e   :  { %v811_v58 = vsel %vm356_vm4, %v3780_v7, 0.0  ;;  %v967_v23 = vpop.permute.xlu1 %966 }
 0x841   :  { %812 = vadd.xlane.f32.xlu0 %v811_v58 }
 0x857   :  { %820 = vrot.lane.b32.xlu0 %v4016_v56, %s3876_s19 }
 0x85b   :  { %916 = vrot.lane.b32.xlu0 %v4014_v53, %s3878_s21  ;;  %v924_v53 = vsel %vm260_vm3, %v919_v13, 0 }
 0x8ca   :  { %v810_v8 = vpop.xlane.xlu0 %809 }
 0x8cb   :  { %3781 = vrcp.f32 %v810_v8 }
 0x8ce   :  { %v813_v9 = vpop.xlane.xlu0 %812 }
 0x8cf   :  { %3783 = vrcp.f32 %v813_v9  ;;  %v3681_v9 = vld [vmem:[%s4664_s5] sm:$0xff]  }
 0x8d2   :  { %v821_v10 = vpop.permute.xlu0 %820 }
 0x8d3   :  { %v826_v11 = vsel %vm384_vm2, %v821_v10, 0  ;;  %v3682_v10 = vld [vmem:[%s4664_s5 + $0x8] sm:$0xff]  }
 0x8d4   :  { %3474 = vmatpush3.bf16.msra.mxu0 %v826_v11  ;;  %v3683_v11 = vld [vmem:[%s4664_s5 + $0x10] sm:$0xff]  }
 0x8d5   :  { %v3782_v12 = vpop.eup %3781  ;;  %3485 = vmatprep.subr.bf16.mxu0 %v3870_v40 }
 0x8d6   :  { %v815_v14 = vmul.f32 %v3782_v12, %v3778_v5  ;;  %v917_v21 = vpop.permute.xlu0 %916  ;;  %v3684_v12 = vld [vmem:[%s4664_s5 + $0x18] sm:$0xff]  }
 0x8d8   :  { %v818_v15 = vpack.c.bf16 %v815_v14, %v815_v14 }
 0x8d9   :  { %v3784_v16 = vpop.eup %3783 }
 0x8da   :  { %v817_v17 = vmul.f32 %v3784_v16, %v3780_v7  ;;  %3476 = vmatmul.mubr.msk.bf16.vlgmr.msra.gmra.mrb[16].mxu0 %vm356_vm4, %v818_v15 }
 0x8db   :  { %3487 = vmatprep.mubr.msk.bf16.mxu0 %vm3871_vm1, %v3870_v40 }
 0x8dc   :  { %v819_v19 = vpack.c.bf16 %v817_v17, %v817_v17 }
 0x8dd   :  { %3486 = vmatpush3.bf16.xpose.msra.mxu0 %v924_v53 }
 0x8de   :  { %3482 = vmatmul.mubr.msk.bf16.vlgmr.msra.gmra.mrb[28].mxu1 %vm356_vm4, %v819_v19  ;;  %3497 = vmatprep.subr.bf16.mxu0 %v3870_v40 }
 0x8df   :  { %3492 = vmatpush3.bf16.xpose.msra.mxu1 %v974_v20  ;;  %3493 = vmatprep.mubr.msk.bf16.mxu1 %vm3871_vm1, %v3870_v40 }
 0x8e0   :  { %3503 = vmatprep.subr.bf16.mxu1 %v3870_v40 }
 0x8e4   :  { %3488 = vmatmul.mubr.msk.bf16.vlgmr.msra.gmra.mrb[20].mxu0 %vm260_vm3, %v917_v21 }
 0x8e5   :  { %3499 = vmatprep.mubr.msk.bf16.mxu0 %vm3871_vm1, %v3870_v40 }
 0x8e6   :  { %3494 = vmatmul.mubr.msk.bf16.vlgmr.msra.gmra.mrb[32].mxu1 %vm260_vm3, %v967_v23 }
 0x8e7   :  { %3505 = vmatprep.mubr.msk.bf16.mxu1 %vm3871_vm1, %v3870_v40 }
 0x9ad   :  { %v862_v24 = vpop.f32.mrb[16].mxu0 }
 0x9ae   :  { %v3477_v25 = vpop.f32.mrb[17].mxu0 }
 0x9af   :  { %v865_v26 = vpop.f32.mrb[18].mxu0 }
 0x9b0   :  { %v3478_v27 = vpop.f32.mrb[19].mxu0 }
 0x9b1   :  { %v910_v28 = vpop.f32.mrb[28].mxu1 }
 0x9b2   :  { %v3644_v29 = vpack.i.bf16 %v910_v28, %v862_v24  ;;  %v3483_v30 = vpop.f32.mrb[29].mxu1 }
 0x9b3   :  { %v913_v32 = vpop.f32.mrb[30].mxu1 }
 0x9b4   :  { %v3484_v33 = vpop.f32.mrb[31].mxu1 }
 0x9b7   :  { %v960_v34 = vpop.f32.mrb[20].mxu0 }
 0x9b8   :  { %v3489_v37 = vpop.f32.mrb[21].mxu0  ;;  %v1016_v38 = vsel %vm356_vm4, %v960_v34, -inf }
 0x9b9   :  { %1017 = vmax.xlane.f32.xlu0 %v1016_v38  ;;  %v963_v41 = vpop.f32.mrb[22].mxu0  ;;  %v1010_v42 = vpop.f32.mrb[32].mxu1 }
 0x9ba   :  { %v3490_v44 = vpop.f32.mrb[23].mxu0  ;;  %v3495_v47 = vpop.f32.mrb[33].mxu1  ;;  %v1019_v48 = vsel %vm356_vm4, %v1010_v42, -inf }
 0x9bb   :  { %1020 = vmax.xlane.f32.xlu1 %v1019_v48  ;;  %v1013_v49 = vpop.f32.mrb[34].mxu1 }
 0x9bc   :  { %v3496_v50 = vpop.f32.mrb[35].mxu1 }
 0x9cc   :  { %1088 = vrot.lane.b32.xlu1 %v4035_v2, %s3878_s21 }
 0x9d0   :  { %3640 = vrot.lane.b32.xlu1 %v3639_v36, %s3877_s20 }
 0x9d4   :  { %3645 = vrot.lane.b32.xlu1 %v3644_v29, %s3875_s18 }
 0xa46   :  { %v1018_v51 = vpop.xlane.xlu0 %1017 }
 0xa47   :  { %v1022_v52 = vsub.f32 %v960_v34, %v1018_v51 }
 0xa48   :  { %v1021_v54 = vpop.xlane.xlu1 %1020 }
 0xa49   :  { %v1024_v55 = vmul.f32 1.442695, %v1022_v52  ;;  %v1023_v57 = vsub.f32 %v1010_v42, %v1021_v54 }
 0xa4b   :  { %3785 = vpow2.f32 %v1024_v55  ;;  %v1026_v59 = vmul.f32 1.442695, %v1023_v57 }
 0xa4c   :  { %v1089_v60 = vpop.permute.xlu1 %1088 }
 0xa4d   :  { %3787 = vpow2.f32 %v1026_v59  ;;  %v1094_v61 = vsel %vm384_vm2, %v1089_v60, 0 }
 0xa4e   :  { %3504 = vmatpush3.bf16.msra.mxu1 %v1094_v61 }
 0xa50   :  { %v3641_v21 = vpop.permute.xlu1 %3640 }
 0xa51   :  { %v3643_v24 = vunpack.i.h.bf16 %v3641_v21  ;;  %v3642_v25 = vunpack.i.l.bf16 %v3641_v21 }
 0xa53   :  { %v1161_v29 = vsel %vm260_vm3, %v4074_v46, %v3643_v24  ;;  %v1160_v30 = vsel %vm260_vm3, %v4072_v39, %v3642_v25  ;;  %v3133_v46 = vld [vmem:[%s4665_s6] ss:$0 sm:$0xff] }
 0xa54   :  { %v3646_v23 = vpop.permute.xlu1 %3645  ;;  %v3697_v24 = vld [vmem:[%s4669_s11 + $0x40] sm:$0xff]  }
 0xa55   :  { %v3786_v2 = vpop.eup %3785  ;;  %v3648_v26 = vunpack.i.h.bf16 %v3646_v23  ;;  %v3647_v27 = vunpack.i.l.bf16 %v3646_v23  ;;  %v3698_v25 = vld [vmem:[%s4669_s11] sm:$0xff]  }
 0xa56   :  { %v1028_v62 = vsel %vm356_vm4, %v3786_v2, 0.0 }
 0xa57   :  { %v3788_v63 = vpop.eup %3787  ;;  %1029 = vadd.xlane.f32.xlu0 %v1028_v62  ;;  %v1163_v34 = vsel %vm1162_vm5, %v1160_v30, %v3647_v27  ;;  %v1164_v37 = vsel %vm1162_vm5, %v1161_v29, %v3648_v26  ;;  %v3699_v26 = vld [vmem:[%s4669_s11 + $0x48] sm:$0xff]   ;;  %v3702_v29 = vld [vmem:[%s4669_s11 + $0x10] sm:$0xff]   ;;  %v3703_v30 = vld [vmem:[%s4669_s11 + $0x58] sm:$0xff]  }
 0xa58   :  { %v1031_v31 = vsel %vm356_vm4, %v3788_v63, 0.0  ;;  %v3700_v27 = vld [vmem:[%s4669_s11 + $0x8] sm:$0xff]  }
 0xa5b   :  { %1032 = vadd.xlane.f32.xlu0 %v1031_v31 }
 0xa71   :  { %1040 = vrot.lane.b32.xlu0 %v4016_v56, %s3878_s21 }
 0xae4   :  { %v1030_v35 = vpop.xlane.xlu0 %1029 }
 0xae5   :  { %3789 = vrcp.f32 %v1030_v35  ;;  %v3687_v35 = vld [vmem:[%s4666_s9 + $0x4] ss:$8 sps:$4 sm:$0xff]  }
 0xae6   :  { %1344 = vmatprep.subr.bf16.mxu1 %v3687_v35 }
 0xae8   :  { %v1033_v36 = vpop.xlane.xlu0 %1032 }
 0xae9   :  { %3791 = vrcp.f32 %v1033_v36  ;;  %v3685_v36 = vld [vmem:[%s4666_s9] ss:$8 sps:$4 sm:$0xff]  }
 0xaec   :  { %v1041_v3 = vpop.permute.xlu0 %1040 }
 0xaed   :  { %v1046_v4 = vsel %vm384_vm2, %v1041_v3, 0  ;;  %v3690_v3 = vld [vmem:[%s4666_s9 + $0x14] ss:$8 sps:$4 sm:$0xff]  }
 0xaee   :  { %3498 = vmatpush3.bf16.msra.mxu0 %v1046_v4  ;;  %v3688_v4 = vld [vmem:[%s4666_s9 + $0x10] ss:$8 sps:$4 sm:$0xff]  }
 0xaef   :  { %v3790_v5 = vpop.eup %3789  ;;  %3509 = vmatprep.subr.bf16.mxu0 %v3870_v40 }
 0xaf0   :  { %v1035_v6 = vmul.f32 %v3790_v5, %v3786_v2  ;;  %v3693_v5 = vld [vmem:[%s4666_s9 + $0x24] ss:$8 sps:$4 sm:$0xff]  }
 0xaf2   :  { %v1038_v7 = vpack.c.bf16 %v1035_v6, %v1035_v6  ;;  %v3691_v6 = vld [vmem:[%s4666_s9 + $0x20] ss:$8 sps:$4 sm:$0xff]  }
 0xaf3   :  { %v3792_v58 = vpop.eup %3791 }
 0xaf4   :  { %v1037_v8 = vmul.f32 %v3792_v58, %v3788_v63  ;;  %3500 = vmatmul.mubr.msk.bf16.vlgmr.msra.gmra.mrb[24].mxu0 %vm356_vm4, %v1038_v7  ;;  %v3694_v7 = vld [vmem:[%s4666_s9 + $0x30] ss:$8 sps:$4 sm:$0xff]   ;;  %v3696_v58 = vld [vmem:[%s4666_s9 + $0x34] ss:$8 sps:$4 sm:$0xff]  }
 0xaf5   :  { %3517 = vmatprep.mubr.msk.bf16.mxu0 %vm3871_vm1, %v3870_v40  ;;  %3510 = vmatpush3.bf16.msra.mxu0 %v3681_v9 }
 0xaf6   :  { %v1039_v56 = vpack.c.bf16 %v1037_v8, %v1037_v8  ;;  %3511 = vmatprep.subr.bf16.mxu0 %v3870_v40 }
 0xaf8   :  { %3506 = vmatmul.mubr.msk.bf16.vlgmr.msra.gmra.mrb[36].mxu1 %vm356_vm4, %v1039_v56 }
 0xaf9   :  { %1376 = vmatprep.mubr.bf16.mxu1 %v3869_v22  ;;  %3512 = vmatpush3.bf16.msra.mxu0 %v3682_v10 }
 0xafa   :  { %3513 = vmatprep.subr.bf16.mxu0 %v3870_v40  ;;  %1345 = vmatpush1.bf16.msra.mxu1 %v3685_v36 }
 0xafb   :  { %1346 = vmatprep.subr.bf16.mxu1 %v3690_v3 }
 0xafd   :  { %3514 = vmatpush3.bf16.msra.mxu0 %v3683_v11 }
 0xafe   :  { %3515 = vmatprep.subr.bf16.mxu0 %v3870_v40  ;;  %1347 = vmatpush1.bf16.msra.mxu1 %v3688_v4 }
 0xaff   :  { %1348 = vmatprep.subr.bf16.mxu1 %v3693_v5 }
 0xb01   :  { %3516 = vmatpush3.bf16.msra.mxu0 %v3684_v12 }
 0xb02   :  { %1349 = vmatpush1.bf16.msra.mxu1 %v3691_v6  ;;  %3332 = vmatprep.subr.bf16.mxu0 %v3697_v24 }
 0xb03   :  { %1350 = vmatprep.subr.bf16.mxu1 %v3696_v58 }
 0xb06   :  { %1351 = vmatpush1.bf16.msra.mxu1 %v3694_v7 }
 0xbc7   :  { %v1082_v13 = vpop.f32.mrb[24].mxu0 }
 0xbc8   :  { %v3501_v14 = vpop.f32.mrb[25].mxu0 }
 0xbc9   :  { %v1085_v15 = vpop.f32.mrb[26].mxu0 }
 0xbca   :  { %v3502_v16 = vpop.f32.mrb[27].mxu0  ;;  %v3134_v15 = vld [vmem:[%s4667_s7] ss:$0 sm:$0xff] }
 0xbcb   :  { %v1130_v17 = vpop.f32.mrb[36].mxu1 }
 0xbcc   :  { %v3649_v18 = vpack.i.bf16 %v1130_v17, %v1082_v13  ;;  %v3507_v53 = vpop.f32.mrb[37].mxu1 }
 0xbcd   :  { %v1133_v19 = vpop.f32.mrb[38].mxu1  ;;  %v3135_v53 = vld [vmem:[%s4668_s8] ss:$0 sm:$0xff] }
 0xbce   :  { %3650 = vrot.lane.b32.xlu0 %v3649_v18, %s3873_s16  ;;  %v3508_v20 = vpop.f32.mrb[39].mxu1 }
 0xc40   :  { %v3651_v28 = vpop.permute.xlu0 %3650 }
 0xc41   :  { %v3653_v32 = vunpack.i.h.bf16 %v3651_v28  ;;  %v3652_v33 = vunpack.i.l.bf16 %v3651_v28  ;;  %v3701_v28 = vld [vmem:[%s4669_s11 + $0x50] sm:$0xff]  }
 0xc43   :  { %v1167_v38 = vsel %vm1165_vm6, %v1164_v37, %v3653_v32  ;;  %v1166_v41 = vsel %vm1165_vm6, %v1163_v34, %v3652_v33  ;;  %v3704_v32 = vld [vmem:[%s4669_s11 + $0x18] sm:$0xff]   ;;  %v3705_v33 = vld [vmem:[%s4669_s11 + $0x60] sm:$0xff]   ;;  %v3707_v37 = vld [vmem:[%s4669_s11 + $0x68] sm:$0xff]  }
 0xc44   :  { %v1168_v42 = vpack.c.bf16 %v1167_v38, %v1166_v41  ;;  %v3706_v34 = vld [vmem:[%s4669_s11 + $0x20] sm:$0xff]   ;;  %v3708_v38 = vld [vmem:[%s4669_s11 + $0x28] sm:$0xff]   ;;  %v3709_v41 = vld [vmem:[%s4669_s11 + $0x70] sm:$0xff]  }
 0xc46   :  { %3518 = vmatmul.mubr.msk.bf16.vlgmr.msra.gmra.mrb[28].mxu0 %vm111_vm0, %v1168_v42  ;;  %v3710_v42 = vld [vmem:[%s4669_s11 + $0x30] sm:$0xff]  }
 0xc47   :  { %3333 = vmatpush3.bf16.msra.mxu0 %v3698_v25 }
 0xc48   :  { %3334 = vmatprep.subr.bf16.mxu0 %v3699_v26 }
 0xc4b   :  { %3335 = vmatpush3.bf16.msra.mxu0 %v3700_v27 }
 0xc4c   :  { %3336 = vmatprep.subr.bf16.mxu0 %v3701_v28 }
 0xc4f   :  { %3337 = vmatpush3.bf16.msra.mxu0 %v3702_v29 }
 0xc50   :  { %3338 = vmatprep.subr.bf16.mxu0 %v3703_v30 }
 0xc53   :  { %3339 = vmatpush3.bf16.msra.mxu0 %v3704_v32 }
 0xc54   :  { %3340 = vmatprep.subr.bf16.mxu0 %v3705_v33 }
 0xc57   :  { %3341 = vmatpush3.bf16.msra.mxu0 %v3706_v34 }
 0xc58   :  { %3342 = vmatprep.subr.bf16.mxu0 %v3707_v37 }
 0xc5b   :  { %3343 = vmatpush3.bf16.msra.mxu0 %v3708_v38 }
 0xc5c   :  { %3344 = vmatprep.subr.bf16.mxu0 %v3709_v41 }
 0xc5f   :  { %3345 = vmatpush3.bf16.msra.mxu0 %v3710_v42 }
 0xd19   :  { %v1230_v44 = vpop.f32.mrb[28].mxu0 }
 0xd1a   :  { %v1237_v39 = vadd.f32 %v1230_v44, %v3952_v0  ;;  %v3519_v47 = vpop.f32.mrb[29].mxu0  ;;  %v3712_v44 = vld [vmem:[%s4669_s11 + $0x38] sm:$0xff]  }
 0xd1b   :  { %v1233_v48 = vpop.f32.mrb[30].mxu0 }
 0xd1c   :  { %v4204_v49 = vadd.f32 %v3133_v46, %v1237_v39  ;;  %v1238_v50 = vadd.f32 %v1233_v48, %v3957_v1  ;;  %v3520_v51 = vpop.f32.mrb[31].mxu0  ;;  %v77_v39 = vld [vmem:[%s4670_s10] sm:$0x3] }
 0xd1d   :  { %v1294_v47 = vrot.slane %v77_v39, %v4001_v43  ;;  %v1298_v48 = vrot.slane %v77_v39, %v4006_v45  ;;  %v3715_v39 = vld [vmem:[%s4660_s3 + $0x44] ss:$8 sps:$4 sm:$0xff]  }
 0xd1e   :  { %v4207_v52 = vadd.f32 %v3133_v46, %v1238_v50  ;;  %v1247_v54 = vsel %vm111_vm0, %v4204_v49, 0.0  ;;  %v3711_v46 = vld [vmem:[%s4669_s11 + $0x78] sm:$0xff]   ;;  %1741 = vmatprep.subr.bf16.mxu1 %v3715_v39 }
 0xd1f   :  { %1248 = vadd.xlane.f32.xlu1 %v1247_v54  ;;  %3346 = vmatprep.subr.bf16.mxu0 %v3711_v46 }
 0xd20   :  { %v1250_v55 = vsel %vm111_vm0, %v4207_v52, 0.0  ;;  %3347 = vmatpush3.bf16.msra.mxu0 %v3712_v44 }
 0xd21   :  { %1251 = vadd.xlane.f32.xlu0 %v1250_v55  ;;  %3533 = vmatprep.subr.bf16.mxu0 %v3870_v40 }
 0xdac   :  { %v1249_v57 = vpop.xlane.xlu1 %1248 }
 0xdad   :  { %v1253_v59 = vmul.f32 0.015625, %v1249_v57 }
 0xdae   :  { %v1252_v0 = vpop.xlane.xlu0 %1251 }
 0xdaf   :  { %v1255_v60 = vsub.f32 %v4204_v49, %v1253_v59  ;;  %v1254_v61 = vmul.f32 0.015625, %v1252_v0 }
 0xdb1   :  { %v1256_v2 = vsub.f32 %v4207_v52, %v1254_v61  ;;  %v1257_v1 = vmul.f32 %v1255_v60, %v1255_v60 }
 0xdb3   :  { %v1259_v62 = vsel %vm111_vm0, %v1257_v1, 0.0  ;;  %v1258_v63 = vmul.f32 %v1256_v2, %v1256_v2 }
 0xdb4   :  { %1260 = vadd.xlane.f32.xlu0 %v1259_v62 }
 0xdb5   :  { %v1262_v31 = vsel %vm111_vm0, %v1258_v63, 0.0 }
 0xdb8   :  { %1263 = vadd.xlane.f32.xlu0 %v1262_v31 }
 0xe41   :  { %v1261_v8 = vpop.xlane.xlu0 %1260 }
 0xe42   :  { %v1265_v56 = vmul.f32 0.015625, %v1261_v8 }
 0xe44   :  { %v1267_v9 = vadd.f32 1e-05, %v1265_v56 }
 0xe45   :  { %v1264_v10 = vpop.xlane.xlu0 %1263 }
 0xe46   :  { %3793 = vrsqrt.f32 %v1267_v9  ;;  %v1266_v11 = vmul.f32 0.015625, %v1264_v10 }
 0xe48   :  { %v1268_v12 = vadd.f32 1e-05, %v1266_v11 }
 0xe4a   :  { %3795 = vrsqrt.f32 %v1268_v12 }
 0xe50   :  { %v3794_v13 = vpop.eup %3793 }
 0xe51   :  { %v1271_v14 = vmul.f32 %v3794_v13, %v1255_v60 }
 0xe53   :  { %v1279_v17 = vmul.f32 %v3134_v15, %v1271_v14 }
 0xe54   :  { %v3796_v16 = vpop.eup %3795 }
 0xe55   :  { %v1272_v18 = vmul.f32 %v3796_v16, %v1256_v2  ;;  %v1287_v20 = vadd.f32 %v3135_v53, %v1279_v17 }
 0xe57   :  { %v1280_v19 = vmul.f32 %v3134_v15, %v1272_v18 }
 0xe59   :  { %v1288_v21 = vadd.f32 %v3135_v53, %v1280_v19 }
 0xe5b   :  { %v1289_v23 = vpack.c.bf16 %v1288_v21, %v1287_v20 }
 0xe5d   :  { %3144 = vmatmul.mubr.msk.bf16.vlgmr.msra.gmra.mrb[40].mxu1 %vm111_vm0, %v1289_v23  ;;  %v3165_v23 = vld [vmem:[%s4671_s12] ss:$0 sm:$0xff] }
 0xe5e   :  { %1773 = vmatprep.mubr.bf16.mxu1 %v3869_v22 }
 0xf30   :  { %v1378_v50 = vpop.f32.mrb[40].mxu1 }
 0xf31   :  { %v1379_v51 = vadd.f32 %v1378_v50, %v1294_v47  ;;  %v1380_v54 = vpop.f32.mrb[41].mxu1  ;;  %v3716_v50 = vld [vmem:[%s4660_s3 + $0x50] ss:$8 sps:$4 sm:$0xff]  }
 0xf32   :  { %v1381_v55 = vadd.f32 %v1380_v54, %v1298_v48  ;;  %v1382_v57 = vpop.f32.mrb[42].mxu1  ;;  %v3719_v54 = vld [vmem:[%s4660_s3 + $0x60] ss:$8 sps:$4 sm:$0xff]  }
 0xf33   :  { %v3145_v59 = vmul.f32 -1.702, %v1379_v51  ;;  %v1383_v0 = vadd.f32 %v1382_v57, %v1294_v47  ;;  %v1384_v60 = vpop.f32.mrb[43].mxu1  ;;  %v3713_v47 = vld [vmem:[%s4660_s3 + $0x40] ss:$8 sps:$4 sm:$0xff]  }
 0xf34   :  { %v3146_v61 = vmul.f32 -1.702, %v1381_v55  ;;  %v1385_v2 = vadd.f32 %v1384_v60, %v1298_v48  ;;  %1742 = vmatpush1.bf16.msra.mxu1 %v3713_v47  ;;  %v3718_v48 = vld [vmem:[%s4660_s3 + $0x54] ss:$8 sps:$4 sm:$0xff]  }
 0xf35   :  { %v1395_v1 = vmul.f32 1.442695, %v3145_v59  ;;  %v3147_v62 = vmul.f32 -1.702, %v1383_v0  ;;  %1743 = vmatprep.subr.bf16.mxu1 %v3718_v48  ;;  %v3724_v57 = vld [vmem:[%s4660_s3 + $0x74] ss:$8 sps:$4 sm:$0xff]  }
 0xf36   :  { %v1397_v63 = vmul.f32 1.442695, %v3146_v61  ;;  %v3148_v31 = vmul.f32 -1.702, %v1385_v2 }
 0xf37   :  { %3797 = vpow2.f32 %v1395_v1  ;;  %v1399_v35 = vmul.f32 1.442695, %v3147_v62 }
 0xf38   :  { %3799 = vpow2.f32 %v1397_v63  ;;  %v1401_v36 = vmul.f32 1.442695, %v3148_v31  ;;  %1744 = vmatpush1.bf16.msra.mxu1 %v3716_v50  ;;  %v3230_v63 = vld [vmem:[%s4661_s1 + $0x1] ss:$0 sm:$0xff] }
 0xf39   :  { %3801 = vpow2.f32 %v1399_v35 }
 0xf3a   :  { %3803 = vpow2.f32 %v1401_v36  ;;  %v3231_v36 = vld [vmem:[%s4662_s2 + $0x1] ss:$0 sm:$0xff] }
 0xf41   :  { %v3798_v3 = vpop.eup %3797 }
 0xf42   :  { %v3800_v4 = vpop.eup %3799  ;;  %v1403_v5 = vadd.f32 1.0, %v3798_v3 }
 0xf43   :  { %v3802_v6 = vpop.eup %3801  ;;  %v1404_v7 = vadd.f32 1.0, %v3800_v4 }
 0xf44   :  { %v3804_v58 = vpop.eup %3803  ;;  %3805 = vrcp.f32 %v1403_v5  ;;  %v1405_v8 = vadd.f32 1.0, %v3802_v6 }
 0xf45   :  { %3807 = vrcp.f32 %v1404_v7  ;;  %v1406_v56 = vadd.f32 1.0, %v3804_v58 }
 0xf46   :  { %3809 = vrcp.f32 %v1405_v8  ;;  %v3176_v8 = vld [vmem:[%s4663_s4 + $0x2] sm:$0x3] }
 0xf47   :  { %3811 = vrcp.f32 %v1406_v56  ;;  %v1691_v56 = vrot.slane %v3176_v8, %v4001_v43 }
 0xf4e   :  { %v3806_v9 = vpop.eup %3805 }
 0xf4f   :  { %v3808_v10 = vpop.eup %3807  ;;  %v1415_v13 = vmul.f32 %v3806_v9, %v1379_v51  ;;  %v3721_v51 = vld [vmem:[%s4660_s3 + $0x64] ss:$8 sps:$4 sm:$0xff]   ;;  %v1695_v9 = vrot.slane %v3176_v8, %v4006_v45 }
 0xf50   :  { %v3810_v11 = vpop.eup %3809  ;;  %v1416_v15 = vmul.f32 %v3808_v10, %v1381_v55  ;;  %1745 = vmatprep.subr.bf16.mxu1 %v3721_v51  ;;  %v3722_v55 = vld [vmem:[%s4660_s3 + $0x70] ss:$8 sps:$4 sm:$0xff]  }
 0xf51   :  { %v3812_v12 = vpop.eup %3811  ;;  %v1417_v14 = vmul.f32 %v3810_v11, %v1383_v0  ;;  %1746 = vmatpush1.bf16.msra.mxu1 %v3719_v54 }
 0xf52   :  { %v1418_v16 = vmul.f32 %v3812_v12, %v1385_v2  ;;  %1747 = vmatprep.subr.bf16.mxu1 %v3724_v57 }
 0xf53   :  { %v1419_v17 = vpack.c.bf16 %v1417_v14, %v1415_v13 }
 0xf54   :  { %v1420_v18 = vpack.c.bf16 %v1418_v16, %v1416_v15 }
 0xf55   :  { %1748 = vmatpush1.bf16.msra.mxu1 %v3722_v55 }
 0xf56   :  { %1549 = vmatprep.mubr.bf16.mxu0 %v1420_v18  ;;  %3521 = vmatprep.subr.bf16.mxu1 %v3870_v40 }
 0xf57   :  { %1550 = vmatmul.mubr.bf16.vlgmr.msra.gmra.mrb[32].mxu0 %v1419_v17 }
 0xf58   :  { %3535 = vmatprep.mubr.msk.bf16.mxu0 %vm3871_vm1, %v3870_v40 }
0x102a   :  { %v3348_v53 = vpop.f32.mrb[32].mxu0 }
0x102b   :  { %v3349_v19 = vpop.f32.mrb[33].mxu0 }
0x102c   :  { %v3350_v20 = vadd.f32 %v3349_v19, %v3348_v53  ;;  %v3351_v21 = vpop.f32.mrb[34].mxu0 }
0x102d   :  { %v3352_v24 = vpop.f32.mrb[35].mxu0 }
0x102e   :  { %v1558_v25 = vadd.f32 %v3350_v20, %v4204_v49  ;;  %v3353_v26 = vadd.f32 %v3352_v24, %v3351_v21 }
0x1030   :  { %v4309_v27 = vadd.f32 %v3165_v23, %v1558_v25  ;;  %v1559_v28 = vadd.f32 %v3353_v26, %v4207_v52 }
0x1032   :  { %v4312_v29 = vadd.f32 %v3165_v23, %v1559_v28  ;;  %v1644_v30 = vsel %vm111_vm0, %v4309_v27, 0.0 }
0x1033   :  { %1645 = vadd.xlane.f32.xlu1 %v1644_v30 }
0x1034   :  { %v1647_v32 = vsel %vm111_vm0, %v4312_v29, 0.0 }
0x1035   :  { %1648 = vadd.xlane.f32.xlu0 %v1647_v32 }
0x10c0   :  { %v1646_v33 = vpop.xlane.xlu1 %1645 }
0x10c1   :  { %v1650_v34 = vmul.f32 0.015625, %v1646_v33 }
0x10c2   :  { %v1649_v37 = vpop.xlane.xlu0 %1648 }
0x10c3   :  { %v1652_v49 = vsub.f32 %v4309_v27, %v1650_v34  ;;  %v1651_v38 = vmul.f32 0.015625, %v1649_v37 }
0x10c5   :  { %v1653_v41 = vsub.f32 %v4312_v29, %v1651_v38  ;;  %v1654_v42 = vmul.f32 %v1652_v49, %v1652_v49 }
0x10c7   :  { %v1656_v52 = vsel %vm111_vm0, %v1654_v42, 0.0  ;;  %v1655_v46 = vmul.f32 %v1653_v41, %v1653_v41 }
0x10c8   :  { %1657 = vadd.xlane.f32.xlu1 %v1656_v52 }
0x10c9   :  { %v1659_v44 = vsel %vm111_vm0, %v1655_v46, 0.0 }
0x10ca   :  { %1660 = vadd.xlane.f32.xlu0 %v1659_v44 }
0x1155   :  { %v1658_v59 = vpop.xlane.xlu1 %1657 }
0x1156   :  { %v1662_v0 = vmul.f32 0.015625, %v1658_v59 }
0x1157   :  { %v1661_v60 = vpop.xlane.xlu0 %1660 }
0x1158   :  { %v1664_v61 = vadd.f32 1e-05, %v1662_v0  ;;  %v1663_v2 = vmul.f32 0.015625, %v1661_v60 }
0x115a   :  { %3813 = vrsqrt.f32 %v1664_v61  ;;  %v1665_v1 = vadd.f32 1e-05, %v1663_v2 }
0x115c   :  { %3815 = vrsqrt.f32 %v1665_v1 }
0x1164   :  { %v3814_v62 = vpop.eup %3813 }
0x1165   :  { %v1668_v31 = vmul.f32 %v3814_v62, %v1652_v49 }
0x1166   :  { %v3816_v35 = vpop.eup %3815 }
0x1167   :  { %v1676_v3 = vmul.f32 %v3230_v63, %v1668_v31  ;;  %v1669_v4 = vmul.f32 %v3816_v35, %v1653_v41 }
0x1169   :  { %v1677_v5 = vmul.f32 %v3230_v63, %v1669_v4  ;;  %v1684_v6 = vadd.f32 %v3231_v36, %v1676_v3 }
0x116b   :  { %v1685_v7 = vadd.f32 %v3231_v36, %v1677_v5 }
0x116d   :  { %v1686_v58 = vpack.c.bf16 %v1685_v7, %v1684_v6 }
0x116f   :  { %3240 = vmatmul.mubr.msk.bf16.vlgmr.msra.gmra.mrb[44].mxu1 %vm111_vm0, %v1686_v58 }
0x1170   :  { %3523 = vmatprep.mubr.msk.bf16.mxu1 %vm3871_vm1, %v3870_v40 }
0x1242   :  { %v1775_v10 = vpop.f32.mrb[44].mxu1 }
0x1243   :  { %v1776_v11 = vadd.f32 %v1775_v10, %v1691_v56  ;;  %v1777_v12 = vpop.f32.mrb[45].mxu1 }
0x1244   :  { %v1778_v13 = vadd.f32 %v1777_v12, %v1695_v9  ;;  %v1779_v14 = vpop.f32.mrb[46].mxu1 }
0x1245   :  { %v4361_v15 = vpack.c.bf16 %v1776_v11, %v1776_v11  ;;  %v1780_v16 = vadd.f32 %v1779_v14, %v1691_v56  ;;  %v1781_v17 = vpop.f32.mrb[47].mxu1 }
0x1246   :  { %v4363_v18 = vpack.c.bf16 %v1778_v13, %v1778_v13  ;;  %v1782_v53 = vadd.f32 %v1781_v17, %v1695_v9 }
0x1247   :  { %v4365_v19 = vpack.c.bf16 %v1780_v16, %v1780_v16  ;;  %1789 = vrot.lane.b32.xlu1 %v4361_v15, %s3872_s15 }
0x1248   :  { %v1914_v20 = vsel %vm384_vm2, %v4363_v18, 0  ;;  %v4382_v26 = vpack.c.bf16 %v1782_v53, %v1782_v53 }
0x1249   :  { %1838 = vrot.lane.b32.xlu0 %v4365_v19, %s3872_s15  ;;  %3534 = vmatpush3.bf16.msra.mxu0 %v1914_v20 }
0x124a   :  { %3545 = vmatprep.subr.bf16.mxu0 %v3870_v40  ;;  %v1960_v28 = vsel %vm384_vm2, %v4382_v26, 0 }
0x12b9   :  { %v1790_v21 = vpop.permute.xlu1 %1789 }
0x12ba   :  { %v1795_v23 = vsel %vm260_vm3, %v1790_v21, 0 }
0x12bb   :  { %3522 = vmatpush3.bf16.xpose.msra.mxu1 %v1795_v23  ;;  %v1839_v24 = vpop.permute.xlu0 %1838 }
0x12bc   :  { %3527 = vmatprep.subr.bf16.mxu1 %v3870_v40  ;;  %v1844_v25 = vsel %vm260_vm3, %v1839_v24, 0 }
0x12c2   :  { %3524 = vmatmul.mubr.msk.bf16.vlgmr.msra.gmra.mrb[48].mxu1 %vm260_vm3, %v4361_v15 }
0x12c3   :  { %3528 = vmatpush3.bf16.xpose.msra.mxu1 %v1844_v25  ;;  %3529 = vmatprep.mubr.msk.bf16.mxu1 %vm3871_vm1, %v3870_v40 }
0x12c4   :  { %3539 = vmatprep.subr.bf16.mxu1 %v3870_v40 }
0x12ca   :  { %3530 = vmatmul.mubr.msk.bf16.vlgmr.msra.gmra.mrb[52].mxu1 %vm260_vm3, %v4365_v19 }
0x12cb   :  { %3540 = vmatpush3.bf16.msra.mxu1 %v1960_v28  ;;  %3541 = vmatprep.mubr.msk.bf16.mxu1 %vm3871_vm1, %v3870_v40 }
0x12cc   :  { %3551 = vmatprep.subr.bf16.mxu1 %v3870_v40 }
0x1395   :  { %v1831_v30 = vpop.f32.mrb[48].mxu1 }
0x1396   :  { %v3525_v32 = vpop.f32.mrb[49].mxu1  ;;  %v1886_v33 = vsel %vm356_vm4, %v1831_v30, -inf }
0x1397   :  { %1887 = vmax.xlane.f32.xlu1 %v1886_v33  ;;  %v1834_v34 = vpop.f32.mrb[50].mxu1 }
0x1398   :  { %v3526_v37 = vpop.f32.mrb[51].mxu1 }
0x139d   :  { %v1880_v49 = vpop.f32.mrb[52].mxu1 }
0x139e   :  { %v3531_v38 = vpop.f32.mrb[53].mxu1  ;;  %v1889_v41 = vsel %vm356_vm4, %v1880_v49, -inf }
0x139f   :  { %1890 = vmax.xlane.f32.xlu0 %v1889_v41  ;;  %v1883_v42 = vpop.f32.mrb[54].mxu1 }
0x13a0   :  { %v3532_v52 = vpop.f32.mrb[55].mxu1 }
0x13a8   :  { %2004 = vrot.lane.b32.xlu1 %v4361_v15, %s3873_s16 }
0x1424   :  { %v1888_v46 = vpop.xlane.xlu1 %1887 }
0x1425   :  { %v1892_v44 = vsub.f32 %v1831_v30, %v1888_v46 }
0x1427   :  { %v1894_v39 = vmul.f32 1.442695, %v1892_v44 }
0x1428   :  { %v2005_v59 = vpop.permute.xlu1 %2004 }
0x1429   :  { %3817 = vpow2.f32 %v1894_v39  ;;  %v2010_v62 = vsel %vm260_vm3, %v2005_v59, 0 }
0x142c   :  { %v1891_v47 = vpop.xlane.xlu0 %1890 }
0x142d   :  { %v1893_v48 = vsub.f32 %v1880_v49, %v1891_v47 }
0x142f   :  { %v1896_v50 = vmul.f32 1.442695, %v1893_v48 }
0x1431   :  { %3819 = vpow2.f32 %v1896_v50 }
0x1433   :  { %v3818_v51 = vpop.eup %3817 }
0x1434   :  { %v1898_v54 = vsel %vm356_vm4, %v3818_v51, 0.0 }
0x1435   :  { %1899 = vadd.xlane.f32.xlu1 %v1898_v54 }
0x143b   :  { %v3820_v55 = vpop.eup %3819 }
0x143c   :  { %v1901_v57 = vsel %vm356_vm4, %v3820_v55, 0.0 }
0x143d   :  { %1902 = vadd.xlane.f32.xlu0 %v1901_v57 }
0x1446   :  { %2002 = vrot.lane.b32.xlu1 %v4361_v15, %s3874_s17 }
0x144a   :  { %2052 = vrot.lane.b32.xlu1 %v4365_v19, %s3874_s17 }
0x1453   :  { %2054 = vrot.lane.b32.xlu0 %v4365_v19, %s3873_s16 }
0x14c2   :  { %v1900_v0 = vpop.xlane.xlu1 %1899 }
0x14c3   :  { %3821 = vrcp.f32 %v1900_v0 }
0x14c6   :  { %v2003_v3 = vpop.permute.xlu1 %2002 }
0x14ca   :  { %v1903_v60 = vpop.xlane.xlu0 %1902  ;;  %v2053_v5 = vpop.permute.xlu1 %2052 }
0x14cb   :  { %3823 = vrcp.f32 %v1903_v60 }
0x14cd   :  { %v3822_v61 = vpop.eup %3821 }
0x14ce   :  { %v1905_v2 = vmul.f32 %v3822_v61, %v3818_v51  ;;  %v2055_v35 = vpop.permute.xlu0 %2054 }
0x14cf   :  { %v2060_v4 = vsel %vm260_vm3, %v2055_v35, 0 }
0x14d0   :  { %v1908_v1 = vpack.c.bf16 %v1905_v2, %v1905_v2 }
0x14d2   :  { %3536 = vmatmul.mubr.msk.bf16.vlgmr.msra.gmra.mrb[36].mxu0 %vm356_vm4, %v1908_v1 }
0x14d3   :  { %3546 = vmatpush3.bf16.xpose.msra.mxu0 %v2010_v62  ;;  %3547 = vmatprep.mubr.msk.bf16.mxu0 %vm3871_vm1, %v3870_v40 }
0x14d4   :  { %3557 = vmatprep.subr.bf16.mxu0 %v3870_v40 }
0x14d5   :  { %v3824_v63 = vpop.eup %3823 }
0x14d6   :  { %v1907_v31 = vmul.f32 %v3824_v63, %v3820_v55 }
0x14d8   :  { %v1909_v36 = vpack.c.bf16 %v1907_v31, %v1907_v31 }
0x14da   :  { %3542 = vmatmul.mubr.msk.bf16.vlgmr.msra.gmra.mrb[56].mxu1 %vm356_vm4, %v1909_v36  ;;  %3548 = vmatmul.mubr.msk.bf16.vlgmr.msra.gmra.mrb[40].mxu0 %vm260_vm3, %v2003_v3 }
0x14db   :  { %3552 = vmatpush3.bf16.xpose.msra.mxu1 %v2060_v4  ;;  %3553 = vmatprep.mubr.msk.bf16.mxu1 %vm3871_vm1, %v3870_v40 }
0x14dc   :  { %3563 = vmatprep.subr.bf16.mxu1 %v3870_v40  ;;  %3559 = vmatprep.mubr.msk.bf16.mxu0 %vm3871_vm1, %v3870_v40 }
0x14e2   :  { %3554 = vmatmul.mubr.msk.bf16.vlgmr.msra.gmra.mrb[60].mxu1 %vm260_vm3, %v2053_v5 }
0x14e3   :  { %3565 = vmatprep.mubr.msk.bf16.mxu1 %vm3871_vm1, %v3870_v40 }
0x15a5   :  { %v4419_v6 = vpop.f32.mrb[36].mxu0 }
0x15a6   :  { %v3537_v7 = vpop.f32.mrb[37].mxu0 }
0x15a7   :  { %v1953_v58 = vpop.f32.mrb[38].mxu0 }
0x15a8   :  { %v3538_v8 = vpop.f32.mrb[39].mxu0 }
0x15ad   :  { %v4421_v56 = vpop.f32.mrb[56].mxu1  ;;  %v2046_v9 = vpop.f32.mrb[40].mxu0 }
0x15ae   :  { %v3543_v10 = vpop.f32.mrb[57].mxu1  ;;  %v3549_v11 = vpop.f32.mrb[41].mxu0  ;;  %v2102_v12 = vsel %vm356_vm4, %v2046_v9, -inf }
0x15af   :  { %2103 = vmax.xlane.f32.xlu1 %v2102_v12  ;;  %v1999_v13 = vpop.f32.mrb[58].mxu1  ;;  %v2049_v14 = vpop.f32.mrb[42].mxu0 }
0x15b0   :  { %v3544_v16 = vpop.f32.mrb[59].mxu1  ;;  %v3550_v17 = vpop.f32.mrb[43].mxu0 }
0x15b5   :  { %v2096_v53 = vpop.f32.mrb[60].mxu1 }
0x15b6   :  { %v3555_v20 = vpop.f32.mrb[61].mxu1  ;;  %v2105_v21 = vsel %vm356_vm4, %v2096_v53, -inf }
0x15b7   :  { %2106 = vmax.xlane.f32.xlu0 %v2105_v21  ;;  %v2099_v23 = vpop.f32.mrb[62].mxu1 }
0x15b8   :  { %v3556_v24 = vpop.f32.mrb[63].mxu1 }
0x15c0   :  { %2127 = vrot.lane.b32.xlu1 %v4363_v18, %s3874_s17 }
0x15c4   :  { %2226 = vrot.lane.b32.xlu1 %v4361_v15, %s3875_s18 }
0x15c8   :  { %2276 = vrot.lane.b32.xlu1 %v4365_v19, %s3875_s18 }
0x15cc   :  { %2224 = vrot.lane.b32.xlu1 %v4361_v15, %s3876_s19 }
0x163c   :  { %v2104_v25 = vpop.xlane.xlu1 %2103 }
0x163d   :  { %v2108_v28 = vsub.f32 %v2046_v9, %v2104_v25 }
0x163f   :  { %v2110_v30 = vmul.f32 1.442695, %v2108_v28 }
0x1640   :  { %v2128_v32 = vpop.permute.xlu1 %2127 }
0x1641   :  { %3825 = vpow2.f32 %v2110_v30  ;;  %v2133_v33 = vsel %vm384_vm2, %v2128_v32, 0 }
0x1642   :  { %3558 = vmatpush3.bf16.msra.mxu0 %v2133_v33 }
0x1643   :  { %3569 = vmatprep.subr.bf16.mxu0 %v3870_v40 }
0x1644   :  { %v2107_v34 = vpop.xlane.xlu0 %2106  ;;  %v2227_v47 = vpop.permute.xlu1 %2226 }
0x1645   :  { %v2109_v37 = vsub.f32 %v2096_v53, %v2107_v34  ;;  %v2232_v55 = vsel %vm260_vm3, %v2227_v47, 0 }
0x1647   :  { %v2112_v49 = vmul.f32 1.442695, %v2109_v37 }
0x1648   :  { %v2277_v57 = vpop.permute.xlu1 %2276 }
0x1649   :  { %3827 = vpow2.f32 %v2112_v49  ;;  %v2282_v2 = vsel %vm260_vm3, %v2277_v57, 0 }
0x164b   :  { %v3826_v38 = vpop.eup %3825 }
0x164c   :  { %v2114_v41 = vsel %vm356_vm4, %v3826_v38, 0.0  ;;  %v2225_v61 = vpop.permute.xlu1 %2224 }
0x164d   :  { %2115 = vadd.xlane.f32.xlu0 %v2114_v41 }
0x1653   :  { %v3828_v42 = vpop.eup %3827 }
0x1654   :  { %v2117_v52 = vsel %vm356_vm4, %v3828_v42, 0.0 }
0x1655   :  { %2118 = vadd.xlane.f32.xlu0 %v2117_v52 }
0x166b   :  { %2176 = vrot.lane.b32.xlu0 %v4382_v26, %s3874_s17 }
0x166f   :  { %2274 = vrot.lane.b32.xlu0 %v4365_v19, %s3876_s19 }
0x16da   :  { %v2116_v46 = vpop.xlane.xlu0 %2115 }
0x16db   :  { %3829 = vrcp.f32 %v2116_v46 }
0x16e2   :  { %v2119_v44 = vpop.xlane.xlu0 %2118 }
0x16e3   :  { %3831 = vrcp.f32 %v2119_v44 }
0x16e5   :  { %v3830_v39 = vpop.eup %3829 }
0x16e6   :  { %v2121_v48 = vmul.f32 %v3830_v39, %v3826_v38  ;;  %v2177_v50 = vpop.permute.xlu0 %2176 }
0x16e7   :  { %v2182_v51 = vsel %vm384_vm2, %v2177_v50, 0 }
0x16e8   :  { %3564 = vmatpush3.bf16.msra.mxu1 %v2182_v51  ;;  %v2124_v54 = vpack.c.bf16 %v2121_v48, %v2121_v48 }
0x16e9   :  { %3575 = vmatprep.subr.bf16.mxu1 %v3870_v40 }
0x16ea   :  { %3560 = vmatmul.mubr.msk.bf16.vlgmr.msra.gmra.mrb[44].mxu0 %vm356_vm4, %v2124_v54  ;;  %v2275_v1 = vpop.permute.xlu0 %2274 }
0x16eb   :  { %3570 = vmatpush3.bf16.xpose.msra.mxu0 %v2232_v55  ;;  %3571 = vmatprep.mubr.msk.bf16.mxu0 %vm3871_vm1, %v3870_v40 }
0x16ec   :  { %3581 = vmatprep.subr.bf16.mxu0 %v3870_v40 }
0x16ed   :  { %v3832_v59 = vpop.eup %3831 }
0x16ee   :  { %v2123_v0 = vmul.f32 %v3832_v59, %v3828_v42 }
0x16f0   :  { %v2125_v60 = vpack.c.bf16 %v2123_v0, %v2123_v0 }
0x16f2   :  { %3566 = vmatmul.mubr.msk.bf16.vlgmr.msra.gmra.mrb[64].mxu1 %vm356_vm4, %v2125_v60  ;;  %3572 = vmatmul.mubr.msk.bf16.vlgmr.msra.gmra.mrb[48].mxu0 %vm260_vm3, %v2225_v61 }
0x16f3   :  { %3576 = vmatpush3.bf16.xpose.msra.mxu1 %v2282_v2  ;;  %3577 = vmatprep.mubr.msk.bf16.mxu1 %vm3871_vm1, %v3870_v40 }
0x16f4   :  { %3587 = vmatprep.subr.bf16.mxu1 %v3870_v40  ;;  %3583 = vmatprep.mubr.msk.bf16.mxu0 %vm3871_vm1, %v3870_v40 }
0x16fa   :  { %3578 = vmatmul.mubr.msk.bf16.vlgmr.msra.gmra.mrb[68].mxu1 %vm260_vm3, %v2275_v1 }
0x16fb   :  { %3589 = vmatprep.mubr.msk.bf16.mxu1 %vm3871_vm1, %v3870_v40 }
0x17bd   :  { %v4459_v62 = vpop.f32.mrb[44].mxu0 }
0x17be   :  { %v3561_v63 = vpop.f32.mrb[45].mxu0 }
0x17bf   :  { %v2172_v31 = vpop.f32.mrb[46].mxu0 }
0x17c0   :  { %v3562_v35 = vpop.f32.mrb[47].mxu0 }
0x17c5   :  { %v4461_v36 = vpop.f32.mrb[64].mxu1  ;;  %v2268_v3 = vpop.f32.mrb[48].mxu0 }
0x17c6   :  { %v3654_v4 = vpack.i.bf16 %v4461_v36, %v4459_v62  ;;  %v3567_v5 = vpop.f32.mrb[65].mxu1  ;;  %v3573_v7 = vpop.f32.mrb[49].mxu0  ;;  %v2324_v58 = vsel %vm356_vm4, %v2268_v3, -inf }
0x17c7   :  { %2325 = vmax.xlane.f32.xlu1 %v2324_v58  ;;  %v2221_v8 = vpop.f32.mrb[66].mxu1  ;;  %v2271_v9 = vpop.f32.mrb[50].mxu0 }
0x17c8   :  { %v3568_v10 = vpop.f32.mrb[67].mxu1  ;;  %v3574_v11 = vpop.f32.mrb[51].mxu0 }
0x17cd   :  { %v2318_v12 = vpop.f32.mrb[68].mxu1 }
0x17ce   :  { %v3579_v13 = vpop.f32.mrb[69].mxu1  ;;  %v2327_v14 = vsel %vm356_vm4, %v2318_v12, -inf }
0x17cf   :  { %2328 = vmax.xlane.f32.xlu0 %v2327_v14  ;;  %v2321_v16 = vpop.f32.mrb[70].mxu1 }
0x17d0   :  { %v3580_v17 = vpop.f32.mrb[71].mxu1 }
0x17d8   :  { %2348 = vrot.lane.b32.xlu1 %v4363_v18, %s3876_s19 }
0x17dc   :  { %2446 = vrot.lane.b32.xlu1 %v4361_v15, %s3877_s20 }
0x17e0   :  { %2496 = vrot.lane.b32.xlu1 %v4365_v19, %s3877_s20 }
0x17e4   :  { %2444 = vrot.lane.b32.xlu1 %v4361_v15, %s3878_s21 }
0x1854   :  { %v2326_v53 = vpop.xlane.xlu1 %2325 }
0x1855   :  { %v2330_v20 = vsub.f32 %v2268_v3, %v2326_v53 }
0x1857   :  { %v2332_v21 = vmul.f32 1.442695, %v2330_v20 }
0x1858   :  { %v2349_v23 = vpop.permute.xlu1 %2348 }
0x1859   :  { %3833 = vpow2.f32 %v2332_v21  ;;  %v2354_v24 = vsel %vm384_vm2, %v2349_v23, 0 }
0x185a   :  { %3582 = vmatpush3.bf16.msra.mxu0 %v2354_v24 }
0x185b   :  { %3593 = vmatprep.subr.bf16.mxu0 %v3870_v40 }
0x185c   :  { %v2329_v25 = vpop.xlane.xlu0 %2328  ;;  %v2447_v41 = vpop.permute.xlu1 %2446 }
0x185d   :  { %v2331_v28 = vsub.f32 %v2318_v12, %v2329_v25  ;;  %v2452_v39 = vsel %vm260_vm3, %v2447_v41, 0  ;;  %v3727_v41 = vld [vmem:[%s4664_s5 + $0x30] sm:$0xff]  }
0x185f   :  { %v2334_v30 = vmul.f32 1.442695, %v2331_v28 }
0x1860   :  { %v2497_v47 = vpop.permute.xlu1 %2496 }
0x1861   :  { %3835 = vpow2.f32 %v2334_v30  ;;  %v2502_v54 = vsel %vm260_vm3, %v2497_v47, 0 }
0x1863   :  { %v3834_v32 = vpop.eup %3833 }
0x1864   :  { %v2336_v33 = vsel %vm356_vm4, %v3834_v32, 0.0  ;;  %v2445_v51 = vpop.permute.xlu1 %2444 }
0x1865   :  { %2337 = vadd.xlane.f32.xlu0 %v2336_v33 }
0x186b   :  { %v3836_v34 = vpop.eup %3835 }
0x186c   :  { %v2339_v15 = vsel %vm356_vm4, %v3836_v34, 0.0 }
0x186d   :  { %2340 = vadd.xlane.f32.xlu0 %v2339_v15 }
0x1883   :  { %2396 = vrot.lane.b32.xlu0 %v4382_v26, %s3876_s19 }
0x1887   :  { %2494 = vrot.lane.b32.xlu0 %v4365_v19, %s3878_s21 }
0x18f2   :  { %v2338_v37 = vpop.xlane.xlu0 %2337 }
0x18f3   :  { %3837 = vrcp.f32 %v2338_v37 }
0x18fa   :  { %v2341_v49 = vpop.xlane.xlu0 %2340 }
0x18fb   :  { %3839 = vrcp.f32 %v2341_v49 }
0x18fd   :  { %v3838_v38 = vpop.eup %3837 }
0x18fe   :  { %v2343_v42 = vmul.f32 %v3838_v38, %v3834_v32  ;;  %v2397_v52 = vpop.permute.xlu0 %2396  ;;  %v3726_v38 = vld [vmem:[%s4664_s5 + $0x28] sm:$0xff]  }
0x18ff   :  { %v2402_v46 = vsel %vm384_vm2, %v2397_v52, 0 }
0x1900   :  { %3588 = vmatpush3.bf16.msra.mxu1 %v2402_v46  ;;  %v2346_v44 = vpack.c.bf16 %v2343_v42, %v2343_v42 }
0x1901   :  { %3599 = vmatprep.subr.bf16.mxu1 %v3870_v40 }
0x1902   :  { %3584 = vmatmul.mubr.msk.bf16.vlgmr.msra.gmra.mrb[52].mxu0 %vm356_vm4, %v2346_v44  ;;  %v2495_v55 = vpop.permute.xlu0 %2494 }
0x1903   :  { %3594 = vmatpush3.bf16.xpose.msra.mxu0 %v2452_v39  ;;  %3595 = vmatprep.mubr.msk.bf16.mxu0 %vm3871_vm1, %v3870_v40 }
0x1904   :  { %3605 = vmatprep.subr.bf16.mxu0 %v3870_v40 }
0x1905   :  { %v3840_v19 = vpop.eup %3839 }
0x1906   :  { %v2345_v48 = vmul.f32 %v3840_v19, %v3836_v34 }
0x1908   :  { %v2347_v50 = vpack.c.bf16 %v2345_v48, %v2345_v48 }
0x190a   :  { %3590 = vmatmul.mubr.msk.bf16.vlgmr.msra.gmra.mrb[72].mxu1 %vm356_vm4, %v2347_v50  ;;  %3596 = vmatmul.mubr.msk.bf16.vlgmr.msra.gmra.mrb[56].mxu0 %vm260_vm3, %v2445_v51 }
0x190b   :  { %3600 = vmatpush3.bf16.xpose.msra.mxu1 %v2502_v54  ;;  %3601 = vmatprep.mubr.msk.bf16.mxu1 %vm3871_vm1, %v3870_v40 }
0x190c   :  { %3611 = vmatprep.subr.bf16.mxu1 %v3870_v40  ;;  %3607 = vmatprep.mubr.msk.bf16.mxu0 %vm3871_vm1, %v3870_v40 }
0x1912   :  { %3602 = vmatmul.mubr.msk.bf16.vlgmr.msra.gmra.mrb[76].mxu1 %vm260_vm3, %v2495_v55 }
0x1913   :  { %3613 = vmatprep.mubr.msk.bf16.mxu1 %vm3871_vm1, %v3870_v40 }
0x19d5   :  { %v2390_v57 = vpop.f32.mrb[52].mxu0 }
0x19d6   :  { %v3585_v59 = vpop.f32.mrb[53].mxu0 }
0x19d7   :  { %v2393_v0 = vpop.f32.mrb[54].mxu0 }
0x19d8   :  { %v3586_v60 = vpop.f32.mrb[55].mxu0 }
0x19dd   :  { %v2438_v61 = vpop.f32.mrb[72].mxu1  ;;  %v2488_v2 = vpop.f32.mrb[56].mxu0 }
0x19de   :  { %v3659_v1 = vpack.i.bf16 %v2438_v61, %v2390_v57  ;;  %v3591_v63 = vpop.f32.mrb[73].mxu1  ;;  %v3597_v31 = vpop.f32.mrb[57].mxu0  ;;  %v2544_v35 = vsel %vm356_vm4, %v2488_v2, -inf }
0x19df   :  { %2545 = vmax.xlane.f32.xlu1 %v2544_v35  ;;  %v2441_v3 = vpop.f32.mrb[74].mxu1  ;;  %v2491_v5 = vpop.f32.mrb[58].mxu0 }
0x19e0   :  { %v3592_v7 = vpop.f32.mrb[75].mxu1  ;;  %v3598_v58 = vpop.f32.mrb[59].mxu0 }
0x19e5   :  { %v2538_v8 = vpop.f32.mrb[76].mxu1 }
0x19e6   :  { %v3603_v9 = vpop.f32.mrb[77].mxu1  ;;  %v2547_v10 = vsel %vm356_vm4, %v2538_v8, -inf }
0x19e7   :  { %2548 = vmax.xlane.f32.xlu0 %v2547_v10  ;;  %v2541_v11 = vpop.f32.mrb[78].mxu1 }
0x19e8   :  { %v3604_v12 = vpop.f32.mrb[79].mxu1 }
0x19f0   :  { %2568 = vrot.lane.b32.xlu1 %v4363_v18, %s3878_s21 }
0x19f4   :  { %3655 = vrot.lane.b32.xlu1 %v3654_v4, %s3877_s20 }
0x19f8   :  { %3660 = vrot.lane.b32.xlu1 %v3659_v1, %s3875_s18 }
0x1a6c   :  { %v2546_v13 = vpop.xlane.xlu1 %2545 }
0x1a6d   :  { %v2550_v14 = vsub.f32 %v2488_v2, %v2546_v13 }
0x1a6f   :  { %v2552_v16 = vmul.f32 1.442695, %v2550_v14 }
0x1a70   :  { %v2569_v17 = vpop.permute.xlu1 %2568 }
0x1a71   :  { %3841 = vpow2.f32 %v2552_v16  ;;  %v2574_v53 = vsel %vm384_vm2, %v2569_v17, 0 }
0x1a72   :  { %3606 = vmatpush3.bf16.msra.mxu0 %v2574_v53 }
0x1a73   :  { %3617 = vmatprep.subr.bf16.mxu0 %v3870_v40 }
0x1a74   :  { %v2549_v20 = vpop.xlane.xlu0 %2548  ;;  %v3656_v51 = vpop.permute.xlu1 %3655 }
0x1a75   :  { %v2551_v21 = vsub.f32 %v2538_v8, %v2549_v20  ;;  %v3658_v55 = vunpack.i.h.bf16 %v3656_v51 }
0x1a77   :  { %v2554_v18 = vmul.f32 1.442695, %v2551_v21  ;;  %v2689_v60 = vsel %vm260_vm3, %v4421_v56, %v3658_v55  ;;  %v3262_v56 = vld [vmem:[%s4665_s6 + $0x1] ss:$0 sm:$0xff]  ;;  %v3743_v55 = vld [vmem:[%s4669_s11 + $0xc8] sm:$0xff]  }
0x1a78   :  { %v3661_v54 = vpop.permute.xlu1 %3660 }
0x1a79   :  { %3843 = vpow2.f32 %v2554_v18  ;;  %v3663_v57 = vunpack.i.h.bf16 %v3661_v54  ;;  %v3662_v59 = vunpack.i.l.bf16 %v3661_v54  ;;  %v3742_v54 = vld [vmem:[%s4669_s11 + $0x80] sm:$0xff]  }
0x1a7b   :  { %v3842_v23 = vpop.eup %3841  ;;  %v2691_v63 = vsel %vm1162_vm5, %v2689_v60, %v3663_v57  ;;  %v3745_v57 = vld [vmem:[%s4669_s11 + $0xd0] sm:$0xff]   ;;  %v3748_v60 = vld [vmem:[%s4669_s11 + $0x98] sm:$0xff]  }
0x1a7c   :  { %v2556_v62 = vsel %vm356_vm4, %v3842_v23, 0.0 }
0x1a7d   :  { %2557 = vadd.xlane.f32.xlu0 %v2556_v62 }
0x1a83   :  { %v3844_v36 = vpop.eup %3843 }
0x1a84   :  { %v2559_v4 = vsel %vm356_vm4, %v3844_v36, 0.0 }
0x1a85   :  { %2560 = vadd.xlane.f32.xlu0 %v2559_v4  ;;  %v3729_v4 = vld [vmem:[%s4666_s9 + $0x40] ss:$8 sps:$4 sm:$0xff]  }
0x1a9b   :  { %2616 = vrot.lane.b32.xlu0 %v4382_v26, %s3878_s21  ;;  %v3725_v26 = vld [vmem:[%s4664_s5 + $0x20] sm:$0xff]  }
0x1b0a   :  { %v2558_v24 = vpop.xlane.xlu0 %2557 }
0x1b0b   :  { %3845 = vrcp.f32 %v2558_v24  ;;  %v3734_v24 = vld [vmem:[%s4666_s9 + $0x54] ss:$8 sps:$4 sm:$0xff]  }
0x1b12   :  { %v2561_v25 = vpop.xlane.xlu0 %2560 }
0x1b13   :  { %3847 = vrcp.f32 %v2561_v25  ;;  %v3732_v25 = vld [vmem:[%s4666_s9 + $0x50] ss:$8 sps:$4 sm:$0xff]  }
0x1b15   :  { %v3846_v28 = vpop.eup %3845 }
0x1b16   :  { %v2563_v30 = vmul.f32 %v3846_v28, %v3842_v23  ;;  %v2617_v32 = vpop.permute.xlu0 %2616  ;;  %v3737_v28 = vld [vmem:[%s4666_s9 + $0x64] ss:$8 sps:$4 sm:$0xff]  }
0x1b17   :  { %v2622_v33 = vsel %vm384_vm2, %v2617_v32, 0  ;;  %v3738_v32 = vld [vmem:[%s4666_s9 + $0x70] ss:$8 sps:$4 sm:$0xff]  }
0x1b18   :  { %3612 = vmatpush3.bf16.msra.mxu1 %v2622_v33  ;;  %v2566_v34 = vpack.c.bf16 %v2563_v30, %v2563_v30  ;;  %v3735_v30 = vld [vmem:[%s4666_s9 + $0x60] ss:$8 sps:$4 sm:$0xff]   ;;  %v3740_v33 = vld [vmem:[%s4666_s9 + $0x74] ss:$8 sps:$4 sm:$0xff]  }
0x1b1a   :  { %3608 = vmatmul.mubr.msk.bf16.vlgmr.msra.gmra.mrb[60].mxu0 %vm356_vm4, %v2566_v34 }
0x1b1b   :  { %3625 = vmatprep.mubr.msk.bf16.mxu0 %vm3871_vm1, %v3870_v40  ;;  %3618 = vmatpush3.bf16.msra.mxu0 %v3725_v26 }
0x1b1c   :  { %3619 = vmatprep.subr.bf16.mxu0 %v3870_v40 }
0x1b1d   :  { %v3848_v15 = vpop.eup %3847 }
0x1b1e   :  { %v2565_v37 = vmul.f32 %v3848_v15, %v3844_v36  ;;  %v3731_v36 = vld [vmem:[%s4666_s9 + $0x44] ss:$8 sps:$4 sm:$0xff]  }
0x1b1f   :  { %3620 = vmatpush3.bf16.msra.mxu0 %v3726_v38  ;;  %2870 = vmatprep.subr.bf16.mxu1 %v3731_v36 }
0x1b20   :  { %v2567_v49 = vpack.c.bf16 %v2565_v37, %v2565_v37  ;;  %3621 = vmatprep.subr.bf16.mxu0 %v3870_v40 }
0x1b22   :  { %3614 = vmatmul.mubr.msk.bf16.vlgmr.msra.gmra.mrb[80].mxu1 %vm356_vm4, %v2567_v49 }
0x1b23   :  { %2902 = vmatprep.mubr.bf16.mxu1 %v3869_v22  ;;  %3622 = vmatpush3.bf16.msra.mxu0 %v3727_v41  ;;  %v3728_v22 = vld [vmem:[%s4664_s5 + $0x38] sm:$0xff]  }
0x1b24   :  { %3623 = vmatprep.subr.bf16.mxu0 %v3870_v40  ;;  %v3657_v40 = vunpack.i.l.bf16 %v3656_v51  ;;  %2871 = vmatpush1.bf16.msra.mxu1 %v3729_v4  ;;  %v3741_v51 = vld [vmem:[%s4669_s11 + $0xc0] sm:$0xff]  }
0x1b25   :  { %2872 = vmatprep.subr.bf16.mxu1 %v3734_v24 }
0x1b26   :  { %v2688_v61 = vsel %vm260_vm3, %v4419_v6, %v3657_v40  ;;  %v3744_v40 = vld [vmem:[%s4669_s11 + $0x88] sm:$0xff]  }
0x1b27   :  { %3624 = vmatpush3.bf16.msra.mxu0 %v3728_v22  ;;  %v2690_v31 = vsel %vm1162_vm5, %v2688_v61, %v3662_v59  ;;  %v3746_v59 = vld [vmem:[%s4669_s11 + $0x90] sm:$0xff]   ;;  %v3749_v61 = vld [vmem:[%s4669_s11 + $0xe0] sm:$0xff]  }
0x1b28   :  { %2873 = vmatpush1.bf16.msra.mxu1 %v3732_v25  ;;  %3391 = vmatprep.subr.bf16.mxu0 %v3741_v51 }
0x1b29   :  { %2874 = vmatprep.subr.bf16.mxu1 %v3737_v28 }
0x1b2c   :  { %2875 = vmatpush1.bf16.msra.mxu1 %v3735_v30 }
0x1b2d   :  { %2876 = vmatprep.subr.bf16.mxu1 %v3740_v33 }
0x1b30   :  { %2877 = vmatpush1.bf16.msra.mxu1 %v3738_v32 }
0x1bed   :  { %v2610_v42 = vpop.f32.mrb[60].mxu0 }
0x1bee   :  { %v3609_v52 = vpop.f32.mrb[61].mxu0 }
0x1bef   :  { %v2613_v46 = vpop.f32.mrb[62].mxu0 }
0x1bf0   :  { %v3610_v44 = vpop.f32.mrb[63].mxu0 }
0x1bf5   :  { %v2658_v39 = vpop.f32.mrb[80].mxu1 }
0x1bf6   :  { %v3664_v47 = vpack.i.bf16 %v2658_v39, %v2610_v42  ;;  %v3615_v19 = vpop.f32.mrb[81].mxu1  ;;  %v3263_v42 = vld [vmem:[%s4667_s7 + $0x1] ss:$0 sm:$0xff] }
0x1bf7   :  { %v2661_v48 = vpop.f32.mrb[82].mxu1  ;;  %v3264_v39 = vld [vmem:[%s4668_s8 + $0x1] ss:$0 sm:$0xff] }
0x1bf8   :  { %3665 = vrot.lane.b32.xlu1 %v3664_v47, %s3873_s16  ;;  %v3616_v50 = vpop.f32.mrb[83].mxu1 }
0x1c6a   :  { %v3666_v0 = vpop.permute.xlu1 %3665 }
0x1c6b   :  { %v3668_v2 = vunpack.i.h.bf16 %v3666_v0  ;;  %v3667_v1 = vunpack.i.l.bf16 %v3666_v0  ;;  %v3747_v0 = vld [vmem:[%s4669_s11 + $0xd8] sm:$0xff]  }
0x1c6d   :  { %v2693_v35 = vsel %vm1165_vm6, %v2691_v63, %v3668_v2  ;;  %v2692_v3 = vsel %vm1165_vm6, %v2690_v31, %v3667_v1  ;;  %v3750_v2 = vld [vmem:[%s4669_s11 + $0xa0] sm:$0xff]   ;;  %v3751_v1 = vld [vmem:[%s4669_s11 + $0xe8] sm:$0xff]   ;;  %v3753_v31 = vld [vmem:[%s4669_s11 + $0xf0] sm:$0xff]  }
0x1c6e   :  { %v2694_v5 = vpack.c.bf16 %v2693_v35, %v2692_v3  ;;  %v3752_v63 = vld [vmem:[%s4669_s11 + $0xa8] sm:$0xff]   ;;  %v3754_v35 = vld [vmem:[%s4669_s11 + $0xb0] sm:$0xff]   ;;  %v3755_v3 = vld [vmem:[%s4669_s11 + $0xf8] sm:$0xff]  }
0x1c70   :  { %3626 = vmatmul.mubr.msk.bf16.vlgmr.msra.gmra.mrb[64].mxu0 %vm111_vm0, %v2694_v5  ;;  %v3756_v5 = vld [vmem:[%s4669_s11 + $0xb8] sm:$0xff]  }
0x1c71   :  { %3392 = vmatpush3.bf16.msra.mxu0 %v3742_v54 }
0x1c72   :  { %3393 = vmatprep.subr.bf16.mxu0 %v3743_v55 }
0x1c75   :  { %3394 = vmatpush3.bf16.msra.mxu0 %v3744_v40 }
0x1c76   :  { %3395 = vmatprep.subr.bf16.mxu0 %v3745_v57 }
0x1c79   :  { %3396 = vmatpush3.bf16.msra.mxu0 %v3746_v59 }
0x1c7a   :  { %3397 = vmatprep.subr.bf16.mxu0 %v3747_v0 }
0x1c7d   :  { %3398 = vmatpush3.bf16.msra.mxu0 %v3748_v60 }
0x1c7e   :  { %3399 = vmatprep.subr.bf16.mxu0 %v3749_v61 }
0x1c81   :  { %3400 = vmatpush3.bf16.msra.mxu0 %v3750_v2 }
0x1c82   :  { %3401 = vmatprep.subr.bf16.mxu0 %v3751_v1 }
0x1c85   :  { %3402 = vmatpush3.bf16.msra.mxu0 %v3752_v63 }
0x1c86   :  { %3403 = vmatprep.subr.bf16.mxu0 %v3753_v31 }
0x1c89   :  { %3404 = vmatpush3.bf16.msra.mxu0 %v3754_v35 }
0x1c8a   :  { %3405 = vmatprep.subr.bf16.mxu0 %v3755_v3 }
0x1c8d   :  { %3406 = vmatpush3.bf16.msra.mxu0 %v3756_v5 }
0x1d43   :  { %v2756_v7 = vpop.f32.mrb[64].mxu0 }
0x1d44   :  { %v2763_v6 = vadd.f32 %v2756_v7, %v4309_v27  ;;  %v3627_v58 = vpop.f32.mrb[65].mxu0 }
0x1d45   :  { %v2759_v8 = vpop.f32.mrb[66].mxu0 }
0x1d46   :  { %v4551_v9 = vadd.f32 %v3262_v56, %v2763_v6  ;;  %v2764_v10 = vadd.f32 %v2759_v8, %v4312_v29  ;;  %v3628_v11 = vpop.f32.mrb[67].mxu0 }
0x1d48   :  { %v4554_v12 = vadd.f32 %v3262_v56, %v2764_v10  ;;  %v2773_v13 = vsel %vm111_vm0, %v4551_v9, 0.0  ;;  %v3196_v56 = vld [vmem:[%s4670_s10 + $0x2] sm:$0x3] }
0x1d49   :  { %2774 = vadd.xlane.f32.xlu0 %v2773_v13  ;;  %v2820_v7 = vrot.slane %v3196_v56, %v4001_v43  ;;  %v2824_v6 = vrot.slane %v3196_v56, %v4006_v45 }
0x1d4a   :  { %v2776_v14 = vsel %vm111_vm0, %v4554_v12, 0.0 }
0x1d4b   :  { %2777 = vadd.xlane.f32.xlu1 %v2776_v14 }
0x1dd6   :  { %v2775_v16 = vpop.xlane.xlu0 %2774 }
0x1dd7   :  { %v2779_v17 = vmul.f32 0.015625, %v2775_v16 }
0x1dd8   :  { %v2778_v27 = vpop.xlane.xlu1 %2777 }
0x1dd9   :  { %v2781_v53 = vsub.f32 %v4551_v9, %v2779_v17  ;;  %v2780_v20 = vmul.f32 0.015625, %v2778_v27 }
0x1ddb   :  { %v2782_v21 = vsub.f32 %v4554_v12, %v2780_v20  ;;  %v2783_v29 = vmul.f32 %v2781_v53, %v2781_v53 }
0x1ddd   :  { %v2785_v18 = vsel %vm111_vm0, %v2783_v29, 0.0  ;;  %v2784_v23 = vmul.f32 %v2782_v21, %v2782_v21 }
0x1dde   :  { %2786 = vadd.xlane.f32.xlu0 %v2785_v18 }
0x1ddf   :  { %v2788_v62 = vsel %vm111_vm0, %v2784_v23, 0.0 }
0x1de2   :  { %2789 = vadd.xlane.f32.xlu0 %v2788_v62 }
0x1e6b   :  { %v2787_v34 = vpop.xlane.xlu0 %2786 }
0x1e6c   :  { %v2791_v15 = vmul.f32 0.015625, %v2787_v34 }
0x1e6e   :  { %v2793_v37 = vadd.f32 1e-05, %v2791_v15 }
0x1e6f   :  { %v2790_v49 = vpop.xlane.xlu0 %2789 }
0x1e70   :  { %3849 = vrsqrt.f32 %v2793_v37  ;;  %v2792_v26 = vmul.f32 0.015625, %v2790_v49 }
0x1e72   :  { %v2794_v38 = vadd.f32 1e-05, %v2792_v26 }
0x1e74   :  { %3851 = vrsqrt.f32 %v2794_v38 }
0x1e7a   :  { %v3850_v41 = vpop.eup %3849 }
0x1e7b   :  { %v2797_v22 = vmul.f32 %v3850_v41, %v2781_v53 }
0x1e7d   :  { %v2805_v46 = vmul.f32 %v3263_v42, %v2797_v22 }
0x1e7e   :  { %v3852_v52 = vpop.eup %3851 }
0x1e7f   :  { %v2798_v44 = vmul.f32 %v3852_v52, %v2782_v21  ;;  %v2813_v19 = vadd.f32 %v3264_v39, %v2805_v46 }
0x1e81   :  { %v2806_v47 = vmul.f32 %v3263_v42, %v2798_v44 }
0x1e83   :  { %v2814_v48 = vadd.f32 %v3264_v39, %v2806_v47  ;;  %v3294_v39 = vld [vmem:[%s4671_s12 + $0x1] ss:$0 sm:$0xff] }
0x1e85   :  { %v2815_v50 = vpack.c.bf16 %v2814_v48, %v2813_v19 }
0x1e87   :  { %3273 = vmatmul.mubr.msk.bf16.vlgmr.msra.gmra.mrb[84].mxu1 %vm111_vm0, %v2815_v50 }
0x1f5a   :  { %v2904_v58 = vpop.f32.mrb[84].mxu1 }
0x1f5b   :  { %v2905_v8 = vadd.f32 %v2904_v58, %v2820_v7  ;;  %v2906_v10 = vpop.f32.mrb[85].mxu1 }
0x1f5c   :  { %v2907_v11 = vadd.f32 %v2906_v10, %v2824_v6  ;;  %v2908_v13 = vpop.f32.mrb[86].mxu1 }
0x1f5d   :  { %v3274_v14 = vmul.f32 -1.702, %v2905_v8  ;;  %v2909_v16 = vadd.f32 %v2908_v13, %v2820_v7  ;;  %v2910_v17 = vpop.f32.mrb[87].mxu1 }
0x1f5e   :  { %v3275_v27 = vmul.f32 -1.702, %v2907_v11  ;;  %v2911_v53 = vadd.f32 %v2910_v17, %v2824_v6 }
0x1f5f   :  { %v2921_v20 = vmul.f32 1.442695, %v3274_v14  ;;  %v3276_v21 = vmul.f32 -1.702, %v2909_v16 }
0x1f60   :  { %v2923_v29 = vmul.f32 1.442695, %v3275_v27  ;;  %v3277_v18 = vmul.f32 -1.702, %v2911_v53 }
0x1f61   :  { %3853 = vpow2.f32 %v2921_v20  ;;  %v2925_v23 = vmul.f32 1.442695, %v3276_v21 }
0x1f62   :  { %3855 = vpow2.f32 %v2923_v29  ;;  %v2927_v43 = vmul.f32 1.442695, %v3277_v18 }
0x1f63   :  { %3857 = vpow2.f32 %v2925_v23 }
0x1f64   :  { %3859 = vpow2.f32 %v2927_v43 }
0x1f6b   :  { %v3854_v45 = vpop.eup %3853 }
0x1f6c   :  { %v3856_v62 = vpop.eup %3855  ;;  %v2929_v36 = vadd.f32 1.0, %v3854_v45 }
0x1f6d   :  { %v3858_v4 = vpop.eup %3857  ;;  %v2930_v24 = vadd.f32 1.0, %v3856_v62 }
0x1f6e   :  { %v3860_v25 = vpop.eup %3859  ;;  %3861 = vrcp.f32 %v2929_v36  ;;  %v2931_v28 = vadd.f32 1.0, %v3858_v4 }
0x1f6f   :  { %3863 = vrcp.f32 %v2930_v24  ;;  %v2932_v30 = vadd.f32 1.0, %v3860_v25 }
0x1f70   :  { %3865 = vrcp.f32 %v2931_v28 }
0x1f71   :  { %3867 = vrcp.f32 %v2932_v30 }
0x1f78   :  { %v3862_v32 = vpop.eup %3861 }
0x1f79   :  { %v3864_v33 = vpop.eup %3863  ;;  %v2941_v37 = vmul.f32 %v3862_v32, %v2905_v8 }
0x1f7a   :  { %v3866_v34 = vpop.eup %3865  ;;  %v2942_v26 = vmul.f32 %v3864_v33, %v2907_v11 }
0x1f7b   :  { %v3868_v15 = vpop.eup %3867  ;;  %v2943_v49 = vmul.f32 %v3866_v34, %v2909_v16 }
0x1f7c   :  { %v2944_v38 = vmul.f32 %v3868_v15, %v2911_v53 }
0x1f7d   :  { %v2945_v41 = vpack.c.bf16 %v2943_v49, %v2941_v37 }
0x1f7e   :  { %v2946_v22 = vpack.c.bf16 %v2944_v38, %v2942_v26 }
0x1f80   :  { %3075 = vmatprep.mubr.bf16.mxu0 %v2946_v22 }
0x1f81   :  { %3076 = vmatmul.mubr.bf16.vlgmr.msra.gmra.mrb[68].mxu0 %v2945_v41 }
0x2054   :  { %v3407_v42 = vpop.f32.mrb[68].mxu0 }
0x2055   :  { %v3408_v52 = vpop.f32.mrb[69].mxu0 }
0x2056   :  { %v3409_v46 = vadd.f32 %v3408_v52, %v3407_v42  ;;  %v3410_v44 = vpop.f32.mrb[70].mxu0 }
0x2057   :  { %v3411_v47 = vpop.f32.mrb[71].mxu0 }
0x2058   :  { %v3084_v19 = vadd.f32 %v3409_v46, %v4551_v9  ;;  %v3412_v48 = vadd.f32 %v3411_v47, %v3410_v44 }
0x205a   :  { %v3092_v50 = vadd.f32 %v3294_v39, %v3084_v19  ;;  %v3085_v51 = vadd.f32 %v3412_v48, %v4554_v12 }
0x205c   :  { %3095 = vst.msk [vmem:[%s4672_s13] sm:$0x1] %vm3094_vm7, %v3092_v50  ;;  %v3093_v54 = vadd.f32 %v3294_v39, %v3085_v51 }
0x205e   :  { %3096 = vst.msk [vmem:[%s4672_s13 + $0x1] sm:$0x1] %vm3094_vm7, %v3093_v54 }

</bundles_post_ra>
